<compile_context>
chip_gen: v6e
topology: v6e:2x2x1
jax: 0.10.0
libtpu: 0.0.40
codegen_flags: <defaults>
</compile_context>

<pallas_src>
import functools

import jax
import jax.numpy as jnp
from jax.experimental import pallas as pl
from jax.experimental.pallas import tpu as pltpu


def _round_up(x, m):
    return (x + m - 1) // m * m


def _stack_kernel(x_ref, w_ref, b_ref, g_ref, bt_ref, o_ref, act_ref,
                  *, dilations, N, L, Cp, d_max):
    # x_ref : (N, L, Cp)        input activations, NLC, channel-padded
    # w_ref : (B, 3*Cp, Cp)     fused conv weights, 3 taps stacked along rows
    # b_ref : (B, 1, Cp)        fused bias (b1 @ w2 + b2)
    # g_ref : (B, 1, Cp)        BN gamma      bt_ref: (B, 1, Cp) BN beta
    # act_ref: VMEM scratch (N, L + 2*d_max, Cp); halo stays zero across blocks
    act_ref[...] = jnp.zeros_like(act_ref)            # zero halos once
    act_ref[:, d_max:d_max + L, :] = x_ref[...]

    for blk, d in enumerate(dilations):               # unrolled (static dilations)
        xp = act_ref[...]                             # (N, Lp, Cp)

        # Three dilated taps around the centre, concatenated on the lane axis
        # -> one big MXU matmul (conv1 and conv2 already fused in the weights).
        taps = [xp[:, d_max + (k - 1) * d:d_max + (k - 1) * d + L, :]
                .reshape(N * L, Cp) for k in range(3)]
        xcat = jnp.concatenate(taps, axis=-1)         # (N*L, 3*Cp)
        y = jnp.dot(xcat, w_ref[blk],
                    preferred_element_type=jnp.float32) + b_ref[blk]

        # Residual add + LeakyReLU(0.2).  taps[1] is the centre (original x).
        z = y + taps[1]
        z = jnp.where(z >= 0, z, 0.2 * z)

        # BatchNorm1d, training mode: per-channel mean / biased var over (N, L).
        mean = jnp.mean(z, axis=0, keepdims=True)
        var = jnp.mean(jnp.square(z - mean), axis=0, keepdims=True)
        out = (z - mean) * jax.lax.rsqrt(var + 1e-5) * g_ref[blk] + bt_ref[blk]

        act_ref[:, d_max:d_max + L, :] = out.reshape(N, L, Cp)

    o_ref[...] = act_ref[:, d_max:d_max + L, :].astype(o_ref.dtype)


def stack_forward(x_ncl, block_params, dilations):
    """Pallas forward of Stack.  x_ncl: (N, C, L) (PyTorch layout)."""
    N, C, L = x_ncl.shape
    Cp = max(128, _round_up(C, 128))                  # lane-dense channel count
    d_max = max(dilations)
    B = len(dilations)
    pc = Cp - C

    # --- weight prep (tiny C x C matmuls, done once per call outside kernel) ---
    w_all, b_all, g_all, bt_all = [], [], [], []
    for (w1_pt, b1, w2_pt, b2, gamma, beta) in block_params:
        w1k = jnp.transpose(w1_pt, (2, 1, 0))         # (3, C_in, C_mid)
        w2 = jnp.transpose(w2_pt[:, :, 0], (1, 0))    # (C_mid, C_out)
        w_eff = jnp.einsum('kim,mo->kio', w1k, w2)    # conv1 o conv2 fused
        b_eff = b1 @ w2 + b2
        w_eff = jnp.pad(w_eff, ((0, 0), (0, pc), (0, pc)))
        w_all.append(w_eff.reshape(3 * Cp, Cp))
        b_all.append(jnp.pad(b_eff, (0, pc)).reshape(1, Cp))
        g_all.append(jnp.pad(gamma, (0, pc)).reshape(1, Cp))
        bt_all.append(jnp.pad(beta, (0, pc)).reshape(1, Cp))
    w_all = jnp.stack(w_all)                          # (B, 3*Cp, Cp)
    b_all = jnp.stack(b_all)                          # (B, 1, Cp)
    g_all = jnp.stack(g_all)
    bt_all = jnp.stack(bt_all)

    x = jnp.transpose(x_ncl, (0, 2, 1))               # NCL -> NLC
    x = jnp.pad(x, ((0, 0), (0, 0), (0, pc))).astype(jnp.float32)

    kernel = functools.partial(_stack_kernel, dilations=tuple(dilations),
                               N=N, L=L, Cp=Cp, d_max=d_max)
    out = pl.pallas_call(
        kernel,
        out_shape=jax.ShapeDtypeStruct((N, L, Cp), jnp.float32),
        grid=(1,),
        in_specs=[
            pl.BlockSpec((N, L, Cp), lambda i: (0, 0, 0)),        # x
            pl.BlockSpec((B, 3 * Cp, Cp), lambda i: (0, 0, 0)),   # fused weights
            pl.BlockSpec((B, 1, Cp), lambda i: (0, 0, 0)),        # fused bias
            pl.BlockSpec((B, 1, Cp), lambda i: (0, 0, 0)),        # bn gamma
            pl.BlockSpec((B, 1, Cp), lambda i: (0, 0, 0)),        # bn beta
        ],
        out_specs=pl.BlockSpec((N, L, Cp), lambda i: (0, 0, 0)),
        scratch_shapes=[pltpu.VMEM((N, L + 2 * d_max, Cp), jnp.float32)],
        compiler_params=pltpu.CompilerParams(
            dimension_semantics=("arbitrary",)),
    )(x, w_all, b_all, g_all, bt_all)

    out = out[:, :, :C]                               # drop channel padding
    return jnp.transpose(out, (0, 2, 1))              # NLC -> NCL


def ref_stack_forward(x_ncl, block_params, dilations):
    """Pure-JAX reference mirroring the PyTorch forward (training-mode BN)."""
    x = x_ncl
    dn = ("NCH", "OIH", "NCH")
    for (w1_pt, b1, w2_pt, b2, gamma, beta), d in zip(block_params, dilations):
        orig = x
        y = jax.lax.conv_general_dilated(x, w1_pt, window_strides=(1,),
                                         padding=[(d, d)], rhs_dilation=(d,),
                                         dimension_numbers=dn)
        y = y + b1[None, :, None]
        y = jax.lax.conv_general_dilated(y, w2_pt, window_strides=(1,),
                                         padding=[(0, 0)], dimension_numbers=dn)
        y = y + b2[None, :, None]
        y = y + orig
        y = jnp.where(y >= 0, y, 0.2 * y)
        mean = jnp.mean(y, axis=(0, 2), keepdims=True)
        var = jnp.mean(jnp.square(y - mean), axis=(0, 2), keepdims=True)
        y = (y - mean) * jax.lax.rsqrt(var + 1e-5)
        y = y * gamma[None, :, None] + beta[None, :, None]
        x = y
    return x


def init_block_params(key, channels):
    k1, k2, k3, k4, k5, k6 = jax.random.split(key, 6)
    w1 = 0.1 * jax.random.normal(k1, (channels, channels, 3), jnp.float32)
    b1 = 0.1 * jax.random.normal(k2, (channels,), jnp.float32)
    w2 = 0.1 * jax.random.normal(k3, (channels, channels, 1), jnp.float32)
    b2 = 0.1 * jax.random.normal(k4, (channels,), jnp.float32)
    gamma = 1.0 + 0.1 * jax.random.normal(k5, (channels,), jnp.float32)
    beta = 0.1 * jax.random.normal(k6, (channels,), jnp.float32)
    return (w1, b1, w2, b2, gamma, beta)


if __name__ == "__main__":
    N, C, L = 2, 32, 16
    dilations = (1, 2, 4)

    key = jax.random.PRNGKey(0)
    kx, *kblocks = jax.random.split(key, 1 + len(dilations))
    x = jax.random.normal(kx, (N, C, L), jnp.float32)  # PyTorch NCL layout
    params = [init_block_params(k, C) for k in kblocks]

    out = stack_forward(x, params, dilations)
    out = jax.block_until_ready(out)

    ref = jax.block_until_ready(ref_stack_forward(x, params, dilations))
    assert out.shape == (N, C, L)
    assert jnp.allclose(out, ref, rtol=2e-4, atol=2e-4), \
        float(jnp.max(jnp.abs(out - ref)))

    print("KERNEL_OK")
</pallas_src>

<mosaic_0001>
module attributes {stable_mosaic.version = 11 : i64} {
  func.func @_stack_kernel(%arg0: i32, %arg1: memref<2x16x128xf32, #tpu.memory_space<vmem>>, %arg2: memref<3x384x128xf32, #tpu.memory_space<vmem>>, %arg3: memref<3x1x128xf32, #tpu.memory_space<vmem>>, %arg4: memref<3x1x128xf32, #tpu.memory_space<vmem>>, %arg5: memref<3x1x128xf32, #tpu.memory_space<vmem>>, %arg6: memref<2x16x128xf32, #tpu.memory_space<vmem>>, %arg7: memref<2x24x128xf32, #tpu.memory_space<vmem>>) attributes {dimension_semantics = [#tpu.dimension_semantics<arbitrary>], iteration_bounds = array<i64: 1>, scalar_prefetch = 0 : i64, scratch_operands = 1 : i64, tpu.core_type = #tpu.core_type<tc>, window_params = [{pipeline_mode = #tpu.pipeline_mode<synchronous>, transform_indices = @transform_0, window_bounds = array<i64: 2, 16, 128>}, {pipeline_mode = #tpu.pipeline_mode<synchronous>, transform_indices = @transform_1, window_bounds = array<i64: 3, 384, 128>}, {pipeline_mode = #tpu.pipeline_mode<synchronous>, transform_indices = @transform_2, window_bounds = array<i64: 3, 1, 128>}, {pipeline_mode = #tpu.pipeline_mode<synchronous>, transform_indices = @transform_3, window_bounds = array<i64: 3, 1, 128>}, {pipeline_mode = #tpu.pipeline_mode<synchronous>, transform_indices = @transform_4, window_bounds = array<i64: 3, 1, 128>}, {pipeline_mode = #tpu.pipeline_mode<synchronous>, transform_indices = @transform_5, window_bounds = array<i64: 2, 16, 128>}]} {
    %cst = arith.constant 0.000000e+00 : f32
    %0 = vector.broadcast %cst : f32 to vector<2x24x128xf32>
    %c0 = arith.constant 0 : index
    %c0_0 = arith.constant 0 : index
    %c0_1 = arith.constant 0 : index
    %1 = vector.load %arg7[%c0, %c0_0, %c0_1] : memref<2x24x128xf32, #tpu.memory_space<vmem>>, vector<2x24x128xf32>
    tpu.vector_store %arg7[%c0, %c0_0, %c0_1], %0 {strides = array<i32>} : memref<2x24x128xf32, #tpu.memory_space<vmem>>, vector<2x24x128xf32>,
    %c0_2 = arith.constant 0 : index
    %c0_3 = arith.constant 0 : index
    %c0_4 = arith.constant 0 : index
    %2 = vector.load %arg1[%c0_2, %c0_3, %c0_4] : memref<2x16x128xf32, #tpu.memory_space<vmem>>, vector<2x16x128xf32>
    %c0_5 = arith.constant 0 : index
    %c4 = arith.constant 4 : index
    %c0_6 = arith.constant 0 : index
    %3 = vector.load %arg7[%c0_5, %c4, %c0_6] : memref<2x24x128xf32, #tpu.memory_space<vmem>>, vector<2x16x128xf32>
    tpu.vector_store %arg7[%c0_5, %c4, %c0_6], %2 {strides = array<i32>} : memref<2x24x128xf32, #tpu.memory_space<vmem>>, vector<2x16x128xf32>,
    %c0_7 = arith.constant 0 : index
    %c0_8 = arith.constant 0 : index
    %c0_9 = arith.constant 0 : index
    %4 = vector.load %arg7[%c0_7, %c0_8, %c0_9] : memref<2x24x128xf32, #tpu.memory_space<vmem>>, vector<2x24x128xf32>
    %5 = vector.extract_strided_slice %4 {offsets = [0, 3, 0], sizes = [2, 16, 128], strides = [1, 1, 1]} : vector<2x24x128xf32> to vector<2x16x128xf32>
    %6 = vector.shape_cast %5 : vector<2x16x128xf32> to vector<32x128xf32>
    %7 = vector.extract_strided_slice %4 {offsets = [0, 4, 0], sizes = [2, 16, 128], strides = [1, 1, 1]} : vector<2x24x128xf32> to vector<2x16x128xf32>
    %8 = vector.shape_cast %7 : vector<2x16x128xf32> to vector<32x128xf32>
    %9 = vector.extract_strided_slice %4 {offsets = [0, 5, 0], sizes = [2, 16, 128], strides = [1, 1, 1]} : vector<2x24x128xf32> to vector<2x16x128xf32>
    %10 = vector.shape_cast %9 : vector<2x16x128xf32> to vector<32x128xf32>
    %11 = tpu.concatenate %6, %8, %10 in 1 : vector<32x128xf32>, vector<32x128xf32>, vector<32x128xf32> -> vector<32x384xf32>
    %c0_10 = arith.constant 0 : index
    %c0_11 = arith.constant 0 : index
    %c0_12 = arith.constant 0 : index
    %12 = vector.load %arg2[%c0_10, %c0_11, %c0_12] : memref<3x384x128xf32, #tpu.memory_space<vmem>>, vector<1x384x128xf32>
    %13 = vector.shape_cast %12 : vector<1x384x128xf32> to vector<384x128xf32>
    %cst_13 = arith.constant dense<0.000000e+00> : vector<32x128xf32>
    %14 = tpu.matmul %11, %13, %cst_13 {dimension_numbers = #tpu.dot_dimension_numbers<[1], [0], [0], [1], [0, 0, 1, 1], [], []>} : vector<32x384xf32>, vector<384x128xf32>, vector<32x128xf32> -> vector<32x128xf32>
    %c0_14 = arith.constant 0 : index
    %c0_15 = arith.constant 0 : index
    %c0_16 = arith.constant 0 : index
    %15 = vector.load %arg3[%c0_14, %c0_15, %c0_16] : memref<3x1x128xf32, #tpu.memory_space<vmem>>, vector<1x1x128xf32>
    %16 = vector.shape_cast %15 : vector<1x1x128xf32> to vector<1x128xf32>
    %17 = vector.broadcast %16 : vector<1x128xf32> to vector<32x128xf32>
    %18 = arith.addf %14, %17 : vector<32x128xf32>
    %19 = arith.addf %18, %8 : vector<32x128xf32>
    %cst_17 = arith.constant 0.000000e+00 : f32
    %20 = vector.broadcast %cst_17 : f32 to vector<32x128xf32>
    %21 = arith.cmpf oge, %19, %20 : vector<32x128xf32>
    %cst_18 = arith.constant 2.000000e-01 : f32
    %22 = vector.broadcast %cst_18 : f32 to vector<32x128xf32>
    %23 = arith.mulf %22, %19 : vector<32x128xf32>
    %24 = arith.select %21, %19, %23 : vector<32x128xi1>, vector<32x128xf32>
    %cst_19 = arith.constant dense<0.000000e+00> : vector<128xf32>
    %25 = vector.multi_reduction <add>, %24, %cst_19 [0] : vector<32x128xf32> to vector<128xf32>
    %26 = vector.shape_cast %25 : vector<128xf32> to vector<1x128xf32>
    %cst_20 = arith.constant 3.200000e+01 : f32
    %27 = vector.broadcast %cst_20 : f32 to vector<1x128xf32>
    %28 = arith.divf %26, %27 : vector<1x128xf32>
    %29 = vector.broadcast %28 : vector<1x128xf32> to vector<32x128xf32>
    %30 = arith.subf %24, %29 : vector<32x128xf32>
    %31 = arith.mulf %30, %30 : vector<32x128xf32>
    %cst_21 = arith.constant dense<0.000000e+00> : vector<128xf32>
    %32 = vector.multi_reduction <add>, %31, %cst_21 [0] : vector<32x128xf32> to vector<128xf32>
    %33 = vector.shape_cast %32 : vector<128xf32> to vector<1x128xf32>
    %cst_22 = arith.constant 3.200000e+01 : f32
    %34 = vector.broadcast %cst_22 : f32 to vector<1x128xf32>
    %35 = arith.divf %33, %34 : vector<1x128xf32>
    %36 = vector.broadcast %28 : vector<1x128xf32> to vector<32x128xf32>
    %37 = arith.subf %24, %36 : vector<32x128xf32>
    %cst_23 = arith.constant 9.99999974E-6 : f32
    %38 = vector.broadcast %cst_23 : f32 to vector<1x128xf32>
    %39 = arith.addf %35, %38 : vector<1x128xf32>
    %40 = math.rsqrt %39 : vector<1x128xf32>
    %41 = vector.broadcast %40 : vector<1x128xf32> to vector<32x128xf32>
    %42 = arith.mulf %37, %41 : vector<32x128xf32>
    %c0_24 = arith.constant 0 : index
    %c0_25 = arith.constant 0 : index
    %c0_26 = arith.constant 0 : index
    %43 = vector.load %arg4[%c0_24, %c0_25, %c0_26] : memref<3x1x128xf32, #tpu.memory_space<vmem>>, vector<1x1x128xf32>
    %44 = vector.shape_cast %43 : vector<1x1x128xf32> to vector<1x128xf32>
    %45 = vector.broadcast %44 : vector<1x128xf32> to vector<32x128xf32>
    %46 = arith.mulf %42, %45 : vector<32x128xf32>
    %c0_27 = arith.constant 0 : index
    %c0_28 = arith.constant 0 : index
    %c0_29 = arith.constant 0 : index
    %47 = vector.load %arg5[%c0_27, %c0_28, %c0_29] : memref<3x1x128xf32, #tpu.memory_space<vmem>>, vector<1x1x128xf32>
    %48 = vector.shape_cast %47 : vector<1x1x128xf32> to vector<1x128xf32>
    %49 = vector.broadcast %48 : vector<1x128xf32> to vector<32x128xf32>
    %50 = arith.addf %46, %49 : vector<32x128xf32>
    %51 = vector.shape_cast %50 : vector<32x128xf32> to vector<2x16x128xf32>
    %c0_30 = arith.constant 0 : index
    %c4_31 = arith.constant 4 : index
    %c0_32 = arith.constant 0 : index
    %52 = vector.load %arg7[%c0_30, %c4_31, %c0_32] : memref<2x24x128xf32, #tpu.memory_space<vmem>>, vector<2x16x128xf32>
    tpu.vector_store %arg7[%c0_30, %c4_31, %c0_32], %51 {strides = array<i32>} : memref<2x24x128xf32, #tpu.memory_space<vmem>>, vector<2x16x128xf32>,
    %c0_33 = arith.constant 0 : index
    %c0_34 = arith.constant 0 : index
    %c0_35 = arith.constant 0 : index
    %53 = vector.load %arg7[%c0_33, %c0_34, %c0_35] : memref<2x24x128xf32, #tpu.memory_space<vmem>>, vector<2x24x128xf32>
    %54 = vector.extract_strided_slice %53 {offsets = [0, 2, 0], sizes = [2, 16, 128], strides = [1, 1, 1]} : vector<2x24x128xf32> to vector<2x16x128xf32>
    %55 = vector.shape_cast %54 : vector<2x16x128xf32> to vector<32x128xf32>
    %56 = vector.extract_strided_slice %53 {offsets = [0, 4, 0], sizes = [2, 16, 128], strides = [1, 1, 1]} : vector<2x24x128xf32> to vector<2x16x128xf32>
    %57 = vector.shape_cast %56 : vector<2x16x128xf32> to vector<32x128xf32>
    %58 = vector.extract_strided_slice %53 {offsets = [0, 6, 0], sizes = [2, 16, 128], strides = [1, 1, 1]} : vector<2x24x128xf32> to vector<2x16x128xf32>
    %59 = vector.shape_cast %58 : vector<2x16x128xf32> to vector<32x128xf32>
    %60 = tpu.concatenate %55, %57, %59 in 1 : vector<32x128xf32>, vector<32x128xf32>, vector<32x128xf32> -> vector<32x384xf32>
    %c1 = arith.constant 1 : index
    %c0_36 = arith.constant 0 : index
    %c0_37 = arith.constant 0 : index
    %61 = vector.load %arg2[%c1, %c0_36, %c0_37] : memref<3x384x128xf32, #tpu.memory_space<vmem>>, vector<1x384x128xf32>
    %62 = vector.shape_cast %61 : vector<1x384x128xf32> to vector<384x128xf32>
    %cst_38 = arith.constant dense<0.000000e+00> : vector<32x128xf32>
    %63 = tpu.matmul %60, %62, %cst_38 {dimension_numbers = #tpu.dot_dimension_numbers<[1], [0], [0], [1], [0, 0, 1, 1], [], []>} : vector<32x384xf32>, vector<384x128xf32>, vector<32x128xf32> -> vector<32x128xf32>
    %c1_39 = arith.constant 1 : index
    %c0_40 = arith.constant 0 : index
    %c0_41 = arith.constant 0 : index
    %64 = vector.load %arg3[%c1_39, %c0_40, %c0_41] : memref<3x1x128xf32, #tpu.memory_space<vmem>>, vector<1x1x128xf32>
    %65 = vector.shape_cast %64 : vector<1x1x128xf32> to vector<1x128xf32>
    %66 = vector.broadcast %65 : vector<1x128xf32> to vector<32x128xf32>
    %67 = arith.addf %63, %66 : vector<32x128xf32>
    %68 = arith.addf %67, %57 : vector<32x128xf32>
    %cst_42 = arith.constant 0.000000e+00 : f32
    %69 = vector.broadcast %cst_42 : f32 to vector<32x128xf32>
    %70 = arith.cmpf oge, %68, %69 : vector<32x128xf32>
    %cst_43 = arith.constant 2.000000e-01 : f32
    %71 = vector.broadcast %cst_43 : f32 to vector<32x128xf32>
    %72 = arith.mulf %71, %68 : vector<32x128xf32>
    %73 = arith.select %70, %68, %72 : vector<32x128xi1>, vector<32x128xf32>
    %cst_44 = arith.constant dense<0.000000e+00> : vector<128xf32>
    %74 = vector.multi_reduction <add>, %73, %cst_44 [0] : vector<32x128xf32> to vector<128xf32>
    %75 = vector.shape_cast %74 : vector<128xf32> to vector<1x128xf32>
    %cst_45 = arith.constant 3.200000e+01 : f32
    %76 = vector.broadcast %cst_45 : f32 to vector<1x128xf32>
    %77 = arith.divf %75, %76 : vector<1x128xf32>
    %78 = vector.broadcast %77 : vector<1x128xf32> to vector<32x128xf32>
    %79 = arith.subf %73, %78 : vector<32x128xf32>
    %80 = arith.mulf %79, %79 : vector<32x128xf32>
    %cst_46 = arith.constant dense<0.000000e+00> : vector<128xf32>
    %81 = vector.multi_reduction <add>, %80, %cst_46 [0] : vector<32x128xf32> to vector<128xf32>
    %82 = vector.shape_cast %81 : vector<128xf32> to vector<1x128xf32>
    %cst_47 = arith.constant 3.200000e+01 : f32
    %83 = vector.broadcast %cst_47 : f32 to vector<1x128xf32>
    %84 = arith.divf %82, %83 : vector<1x128xf32>
    %85 = vector.broadcast %77 : vector<1x128xf32> to vector<32x128xf32>
    %86 = arith.subf %73, %85 : vector<32x128xf32>
    %cst_48 = arith.constant 9.99999974E-6 : f32
    %87 = vector.broadcast %cst_48 : f32 to vector<1x128xf32>
    %88 = arith.addf %84, %87 : vector<1x128xf32>
    %89 = math.rsqrt %88 : vector<1x128xf32>
    %90 = vector.broadcast %89 : vector<1x128xf32> to vector<32x128xf32>
    %91 = arith.mulf %86, %90 : vector<32x128xf32>
    %c1_49 = arith.constant 1 : index
    %c0_50 = arith.constant 0 : index
    %c0_51 = arith.constant 0 : index
    %92 = vector.load %arg4[%c1_49, %c0_50, %c0_51] : memref<3x1x128xf32, #tpu.memory_space<vmem>>, vector<1x1x128xf32>
    %93 = vector.shape_cast %92 : vector<1x1x128xf32> to vector<1x128xf32>
    %94 = vector.broadcast %93 : vector<1x128xf32> to vector<32x128xf32>
    %95 = arith.mulf %91, %94 : vector<32x128xf32>
    %c1_52 = arith.constant 1 : index
    %c0_53 = arith.constant 0 : index
    %c0_54 = arith.constant 0 : index
    %96 = vector.load %arg5[%c1_52, %c0_53, %c0_54] : memref<3x1x128xf32, #tpu.memory_space<vmem>>, vector<1x1x128xf32>
    %97 = vector.shape_cast %96 : vector<1x1x128xf32> to vector<1x128xf32>
    %98 = vector.broadcast %97 : vector<1x128xf32> to vector<32x128xf32>
    %99 = arith.addf %95, %98 : vector<32x128xf32>
    %100 = vector.shape_cast %99 : vector<32x128xf32> to vector<2x16x128xf32>
    %c0_55 = arith.constant 0 : index
    %c4_56 = arith.constant 4 : index
    %c0_57 = arith.constant 0 : index
    %101 = vector.load %arg7[%c0_55, %c4_56, %c0_57] : memref<2x24x128xf32, #tpu.memory_space<vmem>>, vector<2x16x128xf32>
    tpu.vector_store %arg7[%c0_55, %c4_56, %c0_57], %100 {strides = array<i32>} : memref<2x24x128xf32, #tpu.memory_space<vmem>>, vector<2x16x128xf32>,
    %c0_58 = arith.constant 0 : index
    %c0_59 = arith.constant 0 : index
    %c0_60 = arith.constant 0 : index
    %102 = vector.load %arg7[%c0_58, %c0_59, %c0_60] : memref<2x24x128xf32, #tpu.memory_space<vmem>>, vector<2x24x128xf32>
    %103 = vector.extract_strided_slice %102 {offsets = [0, 0, 0], sizes = [2, 16, 128], strides = [1, 1, 1]} : vector<2x24x128xf32> to vector<2x16x128xf32>
    %104 = vector.shape_cast %103 : vector<2x16x128xf32> to vector<32x128xf32>
    %105 = vector.extract_strided_slice %102 {offsets = [0, 4, 0], sizes = [2, 16, 128], strides = [1, 1, 1]} : vector<2x24x128xf32> to vector<2x16x128xf32>
    %106 = vector.shape_cast %105 : vector<2x16x128xf32> to vector<32x128xf32>
    %107 = vector.extract_strided_slice %102 {offsets = [0, 8, 0], sizes = [2, 16, 128], strides = [1, 1, 1]} : vector<2x24x128xf32> to vector<2x16x128xf32>
    %108 = vector.shape_cast %107 : vector<2x16x128xf32> to vector<32x128xf32>
    %109 = tpu.concatenate %104, %106, %108 in 1 : vector<32x128xf32>, vector<32x128xf32>, vector<32x128xf32> -> vector<32x384xf32>
    %c2 = arith.constant 2 : index
    %c0_61 = arith.constant 0 : index
    %c0_62 = arith.constant 0 : index
    %110 = vector.load %arg2[%c2, %c0_61, %c0_62] : memref<3x384x128xf32, #tpu.memory_space<vmem>>, vector<1x384x128xf32>
    %111 = vector.shape_cast %110 : vector<1x384x128xf32> to vector<384x128xf32>
    %cst_63 = arith.constant dense<0.000000e+00> : vector<32x128xf32>
    %112 = tpu.matmul %109, %111, %cst_63 {dimension_numbers = #tpu.dot_dimension_numbers<[1], [0], [0], [1], [0, 0, 1, 1], [], []>} : vector<32x384xf32>, vector<384x128xf32>, vector<32x128xf32> -> vector<32x128xf32>
    %c2_64 = arith.constant 2 : index
    %c0_65 = arith.constant 0 : index
    %c0_66 = arith.constant 0 : index
    %113 = vector.load %arg3[%c2_64, %c0_65, %c0_66] : memref<3x1x128xf32, #tpu.memory_space<vmem>>, vector<1x1x128xf32>
    %114 = vector.shape_cast %113 : vector<1x1x128xf32> to vector<1x128xf32>
    %115 = vector.broadcast %114 : vector<1x128xf32> to vector<32x128xf32>
    %116 = arith.addf %112, %115 : vector<32x128xf32>
    %117 = arith.addf %116, %106 : vector<32x128xf32>
    %cst_67 = arith.constant 0.000000e+00 : f32
    %118 = vector.broadcast %cst_67 : f32 to vector<32x128xf32>
    %119 = arith.cmpf oge, %117, %118 : vector<32x128xf32>
    %cst_68 = arith.constant 2.000000e-01 : f32
    %120 = vector.broadcast %cst_68 : f32 to vector<32x128xf32>
    %121 = arith.mulf %120, %117 : vector<32x128xf32>
    %122 = arith.select %119, %117, %121 : vector<32x128xi1>, vector<32x128xf32>
    %cst_69 = arith.constant dense<0.000000e+00> : vector<128xf32>
    %123 = vector.multi_reduction <add>, %122, %cst_69 [0] : vector<32x128xf32> to vector<128xf32>
    %124 = vector.shape_cast %123 : vector<128xf32> to vector<1x128xf32>
    %cst_70 = arith.constant 3.200000e+01 : f32
    %125 = vector.broadcast %cst_70 : f32 to vector<1x128xf32>
    %126 = arith.divf %124, %125 : vector<1x128xf32>
    %127 = vector.broadcast %126 : vector<1x128xf32> to vector<32x128xf32>
    %128 = arith.subf %122, %127 : vector<32x128xf32>
    %129 = arith.mulf %128, %128 : vector<32x128xf32>
    %cst_71 = arith.constant dense<0.000000e+00> : vector<128xf32>
    %130 = vector.multi_reduction <add>, %129, %cst_71 [0] : vector<32x128xf32> to vector<128xf32>
    %131 = vector.shape_cast %130 : vector<128xf32> to vector<1x128xf32>
    %cst_72 = arith.constant 3.200000e+01 : f32
    %132 = vector.broadcast %cst_72 : f32 to vector<1x128xf32>
    %133 = arith.divf %131, %132 : vector<1x128xf32>
    %134 = vector.broadcast %126 : vector<1x128xf32> to vector<32x128xf32>
    %135 = arith.subf %122, %134 : vector<32x128xf32>
    %cst_73 = arith.constant 9.99999974E-6 : f32
    %136 = vector.broadcast %cst_73 : f32 to vector<1x128xf32>
    %137 = arith.addf %133, %136 : vector<1x128xf32>
    %138 = math.rsqrt %137 : vector<1x128xf32>
    %139 = vector.broadcast %138 : vector<1x128xf32> to vector<32x128xf32>
    %140 = arith.mulf %135, %139 : vector<32x128xf32>
    %c2_74 = arith.constant 2 : index
    %c0_75 = arith.constant 0 : index
    %c0_76 = arith.constant 0 : index
    %141 = vector.load %arg4[%c2_74, %c0_75, %c0_76] : memref<3x1x128xf32, #tpu.memory_space<vmem>>, vector<1x1x128xf32>
    %142 = vector.shape_cast %141 : vector<1x1x128xf32> to vector<1x128xf32>
    %143 = vector.broadcast %142 : vector<1x128xf32> to vector<32x128xf32>
    %144 = arith.mulf %140, %143 : vector<32x128xf32>
    %c2_77 = arith.constant 2 : index
    %c0_78 = arith.constant 0 : index
    %c0_79 = arith.constant 0 : index
    %145 = vector.load %arg5[%c2_77, %c0_78, %c0_79] : memref<3x1x128xf32, #tpu.memory_space<vmem>>, vector<1x1x128xf32>
    %146 = vector.shape_cast %145 : vector<1x1x128xf32> to vector<1x128xf32>
    %147 = vector.broadcast %146 : vector<1x128xf32> to vector<32x128xf32>
    %148 = arith.addf %144, %147 : vector<32x128xf32>
    %149 = vector.shape_cast %148 : vector<32x128xf32> to vector<2x16x128xf32>
    %c0_80 = arith.constant 0 : index
    %c4_81 = arith.constant 4 : index
    %c0_82 = arith.constant 0 : index
    %150 = vector.load %arg7[%c0_80, %c4_81, %c0_82] : memref<2x24x128xf32, #tpu.memory_space<vmem>>, vector<2x16x128xf32>
    tpu.vector_store %arg7[%c0_80, %c4_81, %c0_82], %149 {strides = array<i32>} : memref<2x24x128xf32, #tpu.memory_space<vmem>>, vector<2x16x128xf32>,
    %c0_83 = arith.constant 0 : index
    %c4_84 = arith.constant 4 : index
    %c0_85 = arith.constant 0 : index
    %151 = vector.load %arg7[%c0_83, %c4_84, %c0_85] : memref<2x24x128xf32, #tpu.memory_space<vmem>>, vector<2x16x128xf32>
    %c0_86 = arith.constant 0 : index
    %c0_87 = arith.constant 0 : index
    %c0_88 = arith.constant 0 : index
    %152 = vector.load %arg6[%c0_86, %c0_87, %c0_88] : memref<2x16x128xf32, #tpu.memory_space<vmem>>, vector<2x16x128xf32>
    tpu.vector_store %arg6[%c0_86, %c0_87, %c0_88], %151 {strides = array<i32>} : memref<2x16x128xf32, #tpu.memory_space<vmem>>, vector<2x16x128xf32>,
    return
  }
  func.func @transform_0(%arg0: i32) -> (i32, i32, i32) {
    %c0_i32 = arith.constant 0 : i32
    %c0_i32_0 = arith.constant 0 : i32
    %c0_i32_1 = arith.constant 0 : i32
    %c0_i32_2 = arith.constant 0 : i32
    return %c0_i32, %c0_i32_0, %c0_i32_1 : i32, i32, i32
  }
  func.func @transform_1(%arg0: i32) -> (i32, i32, i32) {
    %c0_i32 = arith.constant 0 : i32
    %c0_i32_0 = arith.constant 0 : i32
    %c0_i32_1 = arith.constant 0 : i32
    %c0_i32_2 = arith.constant 0 : i32
    return %c0_i32, %c0_i32_0, %c0_i32_1 : i32, i32, i32
  }
  func.func @transform_2(%arg0: i32) -> (i32, i32, i32) {
    %c0_i32 = arith.constant 0 : i32
    %c0_i32_0 = arith.constant 0 : i32
    %c0_i32_1 = arith.constant 0 : i32
    %c0_i32_2 = arith.constant 0 : i32
    return %c0_i32, %c0_i32_0, %c0_i32_1 : i32, i32, i32
  }
  func.func @transform_3(%arg0: i32) -> (i32, i32, i32) {
    %c0_i32 = arith.constant 0 : i32
    %c0_i32_0 = arith.constant 0 : i32
    %c0_i32_1 = arith.constant 0 : i32
    %c0_i32_2 = arith.constant 0 : i32
    return %c0_i32, %c0_i32_0, %c0_i32_1 : i32, i32, i32
  }
  func.func @transform_4(%arg0: i32) -> (i32, i32, i32) {
    %c0_i32 = arith.constant 0 : i32
    %c0_i32_0 = arith.constant 0 : i32
    %c0_i32_1 = arith.constant 0 : i32
    %c0_i32_2 = arith.constant 0 : i32
    return %c0_i32, %c0_i32_0, %c0_i32_1 : i32, i32, i32
  }
  func.func @transform_5(%arg0: i32) -> (i32, i32, i32) {
    %c0_i32 = arith.constant 0 : i32
    %c0_i32_0 = arith.constant 0 : i32
    %c0_i32_1 = arith.constant 0 : i32
    %c0_i32_2 = arith.constant 0 : i32
    return %c0_i32, %c0_i32_0, %c0_i32_1 : i32, i32, i32
  }
}

</mosaic_0001>

<bundles_post_ra>
// kernel: tpu_custom_call.1
= control target key start
LH: loop header
LB: loop body
LE: loop exit
PB: predicated region body
PF: predicated region fallthrough
CT: control target
= control target key end

     0   :  { %10 = vsyncpa [#allocation4], 0  ;;  %s1711_s0 = inlined_call_operand.hbm [shape: f32[2,16,128], index: 0, kind: input, shape index: {}]   ;;  %s1712_s1 = inlined_call_operand.hbm [shape: f32[3,384,128], index: 1, kind: input, shape index: {}]   ;;  %s1713_s2 = inlined_call_operand.vmem [shape: f32[3,1,128], index: 2, kind: input, shape index: {}]   ;;  %s1714_s3 = inlined_call_operand.hbm [shape: f32[3,1,128], index: 3, kind: input, shape index: {}]   ;;  %s1715_s4 = inlined_call_operand.vmem [shape: f32[3,1,128], index: 4, kind: input, shape index: {}]   ;;  %s1716_s5 = inlined_call_operand.hbm [shape: f32[2,16,128], index: 5, kind: output, shape index: {}]  }
   0x1   :  { %11 = vsyncpa [#allocation7], 0 }
   0x2   :  { %12 = vsyncpa [#allocation5], 0  ;;  %s1573_s18 = smov [#allocation6]   ;;  %s1574_s20 = smov [#allocation3]  }
   0x3   :  { %s30_s19 = sshll.u32 %s1573_s18, 4  ;;  %s18_s21 = sshll.u32 %s1574_s20, 4  ;;  %s31_s19 = int_to_ptr.vmem [resolvable:$true] %s30_s19  ;;  %s19_s21 = int_to_ptr.vmem [resolvable:$true] %s18_s21 }
   0x4   :  { %s1495_s22 = scalar_lea.vmem %s31_s19, 18432  ;;  %p1500_p1 = scmp.lt.s32.totalorder %s31_s19, %s31_s19 }
   0x5   :  { %p1496_p0 = scmp.ne.s32.totalorder %s31_s19, %s1495_s22  ;;  %p1501_p2 = scmp.lt.s32.totalorder %s1495_s22, %s1495_s22 }
   0x7   :  { %p1502_p3 = por %p1501_p2, %p1500_p1 }
   0x9   :  { %p1503_p4 = pnand %p1502_p3, %p1496_p0 }
   0xb   :  { %1506 = shalt.err (!%p1503_p4)
}
   0xc   :  { %s1575_s23 = smov 128   ;;  %s1576_s24 = smov 8  }
   0xd   :  { %36 = dma.hbm_to_vmem [thread:$0]  %s1712_s1, 18432, %s31_s19, [#allocation7], %s1575_s23, %s1575_s23, %s1576_s24  }
   0xe   :  { %s1515_s27 = scalar_lea.vmem %s19_s21, 512  ;;  %p1520_p6 = scmp.lt.s32.totalorder %s19_s21, %s19_s21 }
   0xf   :  { %p1516_p5 = scmp.ne.s32.totalorder %s19_s21, %s1515_s27  ;;  %p1521_p7 = scmp.lt.s32.totalorder %s1515_s27, %s1515_s27 }
  0x11   :  { %p1522_p8 = por %p1521_p7, %p1520_p6 }
  0x13   :  { %p1523_p9 = pnand %p1522_p8, %p1516_p5 }
  0x15   :  { %1526 = shalt.err (!%p1523_p9)
}
  0x16   :  { %24 = dma.hbm_to_vmem [thread:$0]  %s1711_s0, 512, %s19_s21, [#allocation4], %s1575_s23, %s1575_s23, %s1576_s24  }
  0x17   :  { %s1577_s30 = smov [#allocation8]  }
  0x18   :  { %s44_s6 = sshll.u32 %s1577_s30, 4  ;;  %s45_s6 = int_to_ptr.vmem [resolvable:$true] %s44_s6 }
  0x19   :  { %s1535_s7 = scalar_lea.vmem %s45_s6, 48  ;;  %s1539_s1 = scalar_lea.vmem %s45_s6, 64 }
  0x1a   :  { %p1536_p10 = scmp.ne.s32.totalorder %s45_s6, %s1535_s7  ;;  %p1540_p11 = scmp.lt.s32.totalorder %s45_s6, %s45_s6 }
  0x1b   :  { %p1541_p12 = scmp.lt.s32.totalorder %s1539_s1, %s1535_s7 }
  0x1d   :  { %p1542_p13 = por %p1541_p12, %p1540_p11 }
  0x1f   :  { %p1543_p0 = pnand %p1542_p13, %p1536_p10 }
  0x21   :  { %1546 = shalt.err (!%p1543_p0)
}
  0x22   :  { %s1578_s8 = smov 16   ;;  %s1579_s9 = smov 1  }
  0x23   :  { %50 = dma.hbm_to_vmem [thread:$0]  %s1714_s3, 48, %s45_s6, [#allocation7], %s1578_s8, %s1578_s8, %s1579_s9  }
  0x24   :  { %1567 = dma.done.wait [#allocation4], 512  }
  0x25   :  { %1568 = vsyncadd [#allocation4], 4294966784 }
  0x26   :  { %1569 = dma.done.wait [#allocation7], 18480  }
  0x27   :  { %1570 = vsyncadd [#allocation7], 4294948816  ;;  %v1580_v0 = vmov 0.0   ;;  %v164_v1 = vld [vmem:[#allocation6 + $0xf8] sm:$0xff]  ;;  %v163_v3 = vld [vmem:[#allocation6 + $0xf0] sm:$0xff]  ;;  %vm103_vm0 = vcmask 1043456  }
  0x28   :  { %62 = vst [vmem:[#allocation2] sm:$0xff] %v1580_v0  ;;  %63 = vst [vmem:[#allocation2 + $0x8] sm:$0xff] %v1580_v0  ;;  %v148_v2 = vld [vmem:[#allocation6 + $0x78] sm:$0xff]  ;;  %1166 = vmatprep.subr.mxu0 %v164_v1  ;;  %v147_v4 = vld [vmem:[#allocation6 + $0x70] sm:$0xff]  ;;  %vm88_vm1 = vcmask 1044480   ;;  %vm118_vm2 = vcmask 1042432  }
  0x29   :  { %64 = vst [vmem:[#allocation2 + $0x10] sm:$0xff] %v1580_v0  ;;  %65 = vst [vmem:[#allocation2 + $0x18] sm:$0xff] %v1580_v0  ;;  %v180_v5 = vld [vmem:[#allocation6 + $0x178] sm:$0xff]  ;;  %1167 = vmatpush3.msra.mxu0 %v148_v2  ;;  %v162_v6 = vld [vmem:[#allocation6 + $0xe8] sm:$0xff]  ;;  %vm476_vm7 = vcmask 1041408   ;;  %vm447_vm8 = vcmask 1045504  }
  0x2a   :  { %66 = vst [vmem:[#allocation2 + $0x20] sm:$0xff] %v1580_v0  ;;  %67 = vst [vmem:[#allocation2 + $0x28] sm:$0xff] %v1580_v0  ;;  %1358 = vmatprep.subr.mxu1 %v180_v5  ;;  %v179_v7 = vld [vmem:[#allocation6 + $0x170] sm:$0xff]  ;;  %1168 = vmatprep.subr.mxu0 %v163_v3  ;;  %v146_v8 = vld [vmem:[#allocation6 + $0x68] sm:$0xff]  ;;  %s1581_s21 = smov [#allocation9]  }
  0x2b   :  { %1359 = vmatpush3.msra.mxu1 %v180_v5  ;;  %v178_v9 = vld [vmem:[#allocation6 + $0x168] sm:$0xff]  ;;  %1169 = vmatpush3.msra.mxu0 %v147_v4  ;;  %v161_v10 = vld [vmem:[#allocation6 + $0xe0] sm:$0xff]  ;;  %v160_v13 = vld [vmem:[#allocation6 + $0xd8] sm:$0xff]  ;;  %s1140_s22 = sshll.u32 %s1581_s21, 4  ;;  %s1141_s22 = int_to_ptr.vmem [resolvable:$true] %s1140_s22 }
  0x2c   :  { %1360 = vmatprep.subr.mxu1 %v179_v7  ;;  %1170 = vmatprep.subr.mxu0 %v162_v6  ;;  %v145_v11 = vld [vmem:[#allocation6 + $0x60] sm:$0xff]  ;;  %v144_v14 = vld [vmem:[#allocation6 + $0x58] sm:$0xff]  ;;  %v159_v16 = vld [vmem:[#allocation6 + $0xd0] sm:$0xff]  ;;  %p1552_p2 = scmp.lt.s32.totalorder %s1141_s22, %s1141_s22 }
  0x2d   :  { %1361 = vmatpush3.msra.mxu1 %v179_v7  ;;  %v177_v12 = vld [vmem:[#allocation6 + $0x160] sm:$0xff]  ;;  %1171 = vmatpush3.msra.mxu0 %v146_v8  ;;  %v176_v15 = vld [vmem:[#allocation6 + $0x158] sm:$0xff]  ;;  %v143_v17 = vld [vmem:[#allocation6 + $0x50] sm:$0xff] }
  0x2e   :  { %1362 = vmatprep.subr.mxu1 %v178_v9  ;;  %1172 = vmatprep.subr.mxu0 %v161_v10  ;;  %v175_v18 = vld [vmem:[#allocation6 + $0x150] sm:$0xff]  ;;  %v158_v19 = vld [vmem:[#allocation6 + $0xc8] sm:$0xff]  ;;  %v157_v22 = vld [vmem:[#allocation6 + $0xc0] sm:$0xff] }
  0x2f   :  { %1363 = vmatpush3.msra.mxu1 %v178_v9  ;;  %1173 = vmatpush3.msra.mxu0 %v145_v11  ;;  %v142_v20 = vld [vmem:[#allocation6 + $0x48] sm:$0xff]  ;;  %v141_v23 = vld [vmem:[#allocation6 + $0x40] sm:$0xff]  ;;  %v156_v25 = vld [vmem:[#allocation6 + $0xb8] sm:$0xff] }
  0x30   :  { %1364 = vmatprep.subr.mxu1 %v177_v12  ;;  %1174 = vmatprep.subr.mxu0 %v160_v13  ;;  %v174_v21 = vld [vmem:[#allocation6 + $0x148] sm:$0xff]  ;;  %v173_v24 = vld [vmem:[#allocation6 + $0x140] sm:$0xff]  ;;  %v140_v26 = vld [vmem:[#allocation6 + $0x38] sm:$0xff] }
  0x31   :  { %1365 = vmatpush3.msra.mxu1 %v177_v12  ;;  %1175 = vmatpush3.msra.mxu0 %v144_v14  ;;  %v172_v27 = vld [vmem:[#allocation6 + $0x138] sm:$0xff]  ;;  %v68_v28 = vld [vmem:[#allocation3] sm:$0xff]  ;;  %v69_v29 = vld [vmem:[#allocation3 + $0x8] sm:$0xff] }
  0x32   :  { %1366 = vmatprep.subr.mxu1 %v176_v15  ;;  %1176 = vmatprep.subr.mxu0 %v159_v16  ;;  %v155_v30 = vld [vmem:[#allocation6 + $0xb0] sm:$0xff]  ;;  %72 = vst [vmem:[#allocation2 + $0x4] sm:$0xff] %v68_v28  ;;  %73 = vst [vmem:[#allocation2 + $0xc] sm:$0xff] %v69_v29  ;;  %v71_v34 = vld [vmem:[#allocation3 + $0x18] sm:$0xff] }
  0x33   :  { %1367 = vmatpush3.msra.mxu1 %v176_v15  ;;  %1177 = vmatpush3.msra.mxu0 %v143_v17  ;;  %v70_v31 = vld [vmem:[#allocation3 + $0x10] sm:$0xff]  ;;  %v154_v35 = vld [vmem:[#allocation6 + $0xa8] sm:$0xff]  ;;  %75 = vst [vmem:[#allocation2 + $0x24] sm:$0xff] %v71_v34  ;;  %v153_v38 = vld [vmem:[#allocation6 + $0xa0] sm:$0xff] }
  0x34   :  { %1368 = vmatprep.subr.mxu1 %v175_v18  ;;  %1178 = vmatprep.subr.mxu0 %v158_v19  ;;  %v139_v32 = vld [vmem:[#allocation6 + $0x30] sm:$0xff]  ;;  %74 = vst [vmem:[#allocation2 + $0x1c] sm:$0xff] %v70_v31  ;;  %v138_v36 = vld [vmem:[#allocation6 + $0x28] sm:$0xff]  ;;  %v137_v39 = vld [vmem:[#allocation6 + $0x20] sm:$0xff] }
  0x35   :  { %1369 = vmatpush3.msra.mxu1 %v175_v18  ;;  %1179 = vmatpush3.msra.mxu0 %v142_v20  ;;  %v171_v33 = vld [vmem:[#allocation6 + $0x130] sm:$0xff]  ;;  %v170_v37 = vld [vmem:[#allocation6 + $0x128] sm:$0xff]  ;;  %v169_v40 = vld [vmem:[#allocation6 + $0x120] sm:$0xff] }
  0x36   :  { %1370 = vmatprep.subr.mxu1 %v174_v21  ;;  %1180 = vmatprep.subr.mxu0 %v157_v22  ;;  %v152_v41 = vld [vmem:[#allocation6 + $0x98] sm:$0xff]  ;;  %v151_v46 = vld [vmem:[#allocation6 + $0x90] sm:$0xff]  ;;  %v150_v52 = vld [vmem:[#allocation6 + $0x88] sm:$0xff] }
  0x37   :  { %1371 = vmatpush3.msra.mxu1 %v174_v21  ;;  %1181 = vmatpush3.msra.mxu0 %v141_v23  ;;  %v136_v42 = vld [vmem:[#allocation6 + $0x18] sm:$0xff]  ;;  %v135_v50 = vld [vmem:[#allocation6 + $0x10] sm:$0xff]  ;;  %v134_v56 = vld [vmem:[#allocation6 + $0x8] sm:$0xff] }
  0x38   :  { %1372 = vmatprep.subr.mxu1 %v173_v24  ;;  %1182 = vmatprep.subr.mxu0 %v156_v25  ;;  %v168_v43 = vld [vmem:[#allocation6 + $0x118] sm:$0xff]  ;;  %v167_v51 = vld [vmem:[#allocation6 + $0x110] sm:$0xff]  ;;  %v149_v57 = vld [vmem:[#allocation6 + $0x80] sm:$0xff] }
  0x39   :  { %1373 = vmatpush3.msra.mxu1 %v173_v24  ;;  %1183 = vmatpush3.msra.mxu0 %v140_v26  ;;  %v76_v44 = vld [vmem:[#allocation2] sm:$0xff]  ;;  %v77_v45 = vld [vmem:[#allocation2 + $0x8] sm:$0xff]  ;;  %v78_v49 = vld [vmem:[#allocation2 + $0x10] sm:$0xff] }
  0x3a   :  { %1374 = vmatprep.subr.mxu1 %v172_v27  ;;  %1184 = vmatprep.subr.mxu0 %v155_v30  ;;  %v104_v47 = vrot.slane %v76_v44, 4  ;;  %v105_v48 = vrot.slane %v77_v45, 4  ;;  %v89_v54 = vrot.slane %v76_v44, 3  ;;  %v90_v55 = vrot.slane %v77_v45, 3  ;;  %v166_v59 = vld [vmem:[#allocation6 + $0x108] sm:$0xff]  ;;  %v133_v0 = vld [vmem:[#allocation6] sm:$0xff] }
  0x3b   :  { %1375 = vmatpush3.msra.mxu1 %v172_v27  ;;  %1185 = vmatpush3.msra.mxu0 %v139_v32  ;;  %v107_v58 = vrot.slane %v78_v49, 4  ;;  %v119_v60 = vrot.slane %v76_v44, 5  ;;  %v120_v61 = vrot.slane %v77_v45, 5  ;;  %v79_v62 = vld [vmem:[#allocation2 + $0x18] sm:$0xff]  ;;  %v80_v63 = vld [vmem:[#allocation2 + $0x20] sm:$0xff]  ;;  %v122_v1 = vrot.slane %v78_v49, 5 }
  0x3c   :  { %1376 = vmatprep.subr.mxu1 %v171_v33  ;;  %1186 = vmatprep.subr.mxu0 %v154_v35  ;;  %v1628_v53 = vsel %vm103_vm0, %v104_v47, %v105_v48  ;;  %v91_v2 = vsel %vm88_vm1, %v89_v54, %v90_v55  ;;  %v165_v3 = vld [vmem:[#allocation6 + $0x100] sm:$0xff]  ;;  %v92_v4 = vrot.slane %v78_v49, 3  ;;  %v81_v5 = vld [vmem:[#allocation2 + $0x28] sm:$0xff]  ;;  %v124_v6 = vrot.slane %v79_v62, 5  ;;  %v522_v28 = vld [vmem:[#allocation6 + $0x270] sm:$0xff] }
  0x3d   :  { %1377 = vmatpush3.msra.mxu1 %v171_v33  ;;  %1187 = vmatpush3.msra.mxu0 %v138_v36  ;;  %v125_v7 = vrot.slane %v80_v63, 5  ;;  %v1633_v8 = vsel %vm103_vm0, %v105_v48, %v107_v58  ;;  %v109_v9 = vrot.slane %v79_v62, 4  ;;  %v110_v10 = vrot.slane %v80_v63, 4  ;;  %v523_v25 = vld [vmem:[#allocation6 + $0x278] sm:$0xff]  ;;  %v538_v29 = vld [vmem:[#allocation6 + $0x2f0] sm:$0xff]  ;;  %v521_v31 = vld [vmem:[#allocation6 + $0x268] sm:$0xff] }
  0x3e   :  { %1378 = vmatprep.subr.mxu1 %v170_v37  ;;  %1188 = vmatprep.subr.mxu0 %v153_v38  ;;  %v121_v11 = vsel %vm118_vm2, %v119_v60, %v120_v61  ;;  %v123_v12 = vsel %vm118_vm2, %v120_v61, %v122_v1  ;;  %v127_v13 = vrot.slane %v81_v5, 5  ;;  %v93_v14 = vsel %vm88_vm1, %v90_v55, %v92_v4  ;;  %v539_v26 = vld [vmem:[#allocation6 + $0x2f8] sm:$0xff]  ;;  %v506_v30 = vld [vmem:[#allocation6 + $0x1f0] sm:$0xff]  ;;  %v537_v32 = vld [vmem:[#allocation6 + $0x2e8] sm:$0xff] }
  0x3f   :  { %1379 = vmatpush3.msra.mxu1 %v170_v37  ;;  %1189 = vmatpush3.msra.mxu0 %v137_v39  ;;  %v94_v15 = vrot.slane %v79_v62, 3  ;;  %v95_v16 = vrot.slane %v80_v63, 3  ;;  %v126_v17 = vsel %vm118_vm2, %v124_v6, %v125_v7  ;;  %v1641_v18 = vsel %vm103_vm0, %v109_v9, %v110_v10  ;;  %v507_v27 = vld [vmem:[#allocation6 + $0x1f8] sm:$0xff]  ;;  %v505_v33 = vld [vmem:[#allocation6 + $0x1e8] sm:$0xff]  ;;  %v520_v34 = vld [vmem:[#allocation6 + $0x260] sm:$0xff] }
  0x40   :  { %1380 = vmatprep.subr.mxu1 %v169_v40  ;;  %1190 = vmatprep.subr.mxu0 %v152_v41  ;;  %v112_v19 = vrot.slane %v81_v5, 4  ;;  %v128_v20 = vsel %vm118_vm2, %v125_v7, %v127_v13  ;;  %v97_v22 = vrot.slane %v81_v5, 3  ;;  %v536_v35 = vld [vmem:[#allocation6 + $0x2e0] sm:$0xff]  ;;  %v519_v37 = vld [vmem:[#allocation6 + $0x258] sm:$0xff]  ;;  %v534_v41 = vld [vmem:[#allocation6 + $0x2d0] sm:$0xff] }
  0x41   :  { %1381 = vmatpush3.msra.mxu1 %v169_v40  ;;  %1191 = vmatpush3.msra.mxu0 %v136_v42  ;;  %v96_v21 = vsel %vm88_vm1, %v94_v15, %v95_v16  ;;  %v504_v36 = vld [vmem:[#allocation6 + $0x1e0] sm:$0xff]  ;;  %v535_v38 = vld [vmem:[#allocation6 + $0x2d8] sm:$0xff]  ;;  %v518_v40 = vld [vmem:[#allocation6 + $0x250] sm:$0xff] }
  0x42   :  { %1382 = vmatprep.subr.mxu1 %v168_v43  ;;  %1192 = vmatprep.subr.mxu0 %v151_v46  ;;  %v1647_v23 = vsel %vm103_vm0, %v110_v10, %v112_v19  ;;  %v98_v24 = vsel %vm88_vm1, %v95_v16, %v97_v22  ;;  %v503_v39 = vld [vmem:[#allocation6 + $0x1d8] sm:$0xff]  ;;  %v502_v42 = vld [vmem:[#allocation6 + $0x1d0] sm:$0xff]  ;;  %v533_v44 = vld [vmem:[#allocation6 + $0x2c8] sm:$0xff] }
  0x43   :  { %1383 = vmatpush3.msra.mxu1 %v168_v43  ;;  %1193 = vmatpush3.msra.mxu0 %v135_v50  ;;  %v517_v43 = vld [vmem:[#allocation6 + $0x248] sm:$0xff]  ;;  %v516_v46 = vld [vmem:[#allocation6 + $0x240] sm:$0xff]  ;;  %v515_v49 = vld [vmem:[#allocation6 + $0x238] sm:$0xff] }
  0x44   :  { %1384 = vmatprep.subr.mxu1 %v167_v51  ;;  %1194 = vmatprep.subr.mxu0 %v150_v52  ;;  %v501_v45 = vld [vmem:[#allocation6 + $0x1c8] sm:$0xff]  ;;  %v532_v47 = vld [vmem:[#allocation6 + $0x2c0] sm:$0xff]  ;;  %v531_v50 = vld [vmem:[#allocation6 + $0x2b8] sm:$0xff] }
  0x45   :  { %252 = vmatprep.mubr.f32.mxu0 %v1628_v53  ;;  %1195 = vmatpush3.msra.mxu0 %v134_v56  ;;  %v500_v48 = vld [vmem:[#allocation6 + $0x1c0] sm:$0xff]  ;;  %v514_v52 = vld [vmem:[#allocation6 + $0x230] sm:$0xff]  ;;  %v513_v56 = vld [vmem:[#allocation6 + $0x228] sm:$0xff] }
  0x46   :  { %1385 = vmatpush3.msra.mxu1 %v167_v51  ;;  %1196 = vmatprep.subr.mxu0 %v149_v57  ;;  %v499_v51 = vld [vmem:[#allocation6 + $0x1b8] sm:$0xff]  ;;  %v530_v54 = vld [vmem:[#allocation6 + $0x2b0] sm:$0xff]  ;;  %v529_v57 = vld [vmem:[#allocation6 + $0x2a8] sm:$0xff] }
  0x47   :  { %1386 = vmatprep.subr.mxu1 %v166_v59  ;;  %1197 = vmatpush3.msra.mxu0 %v133_v0  ;;  %v498_v55 = vld [vmem:[#allocation6 + $0x1b0] sm:$0xff]  ;;  %v497_v58 = vld [vmem:[#allocation6 + $0x1a8] sm:$0xff]  ;;  %v528_v60 = vld [vmem:[#allocation6 + $0x2a0] sm:$0xff] }
  0x48   :  { %1387 = vmatpush3.msra.mxu1 %v166_v59  ;;  %253 = vmatmul.mubr.f32.vlgmr.msra.gmra.mxu0 %v91_v2  ;;  %v512_v59 = vld [vmem:[#allocation6 + $0x220] sm:$0xff]  ;;  %v511_v62 = vld [vmem:[#allocation6 + $0x218] sm:$0xff]  ;;  %v510_v1 = vld [vmem:[#allocation6 + $0x210] sm:$0xff] }
  0x49   :  { %1388 = vmatprep.subr.mxu1 %v165_v3  ;;  %257 = vmatprep.mubr.f32.mxu0 %v1633_v8  ;;  %v496_v61 = vld [vmem:[#allocation6 + $0x1a0] sm:$0xff]  ;;  %v527_v63 = vld [vmem:[#allocation6 + $0x298] sm:$0xff]  ;;  %v526_v2 = vld [vmem:[#allocation6 + $0x290] sm:$0xff] }
  0x4a   :  { %1389 = vmatpush3.msra.mxu1 %v165_v3  ;;  %1390 = vmatprep.mubr.f32.mxu1 %v121_v11  ;;  %v495_v0 = vld [vmem:[#allocation6 + $0x198] sm:$0xff]  ;;  %v494_v3 = vld [vmem:[#allocation6 + $0x190] sm:$0xff]  ;;  %v509_v4 = vld [vmem:[#allocation6 + $0x208] sm:$0xff] }
  0x4b   :  { %1391 = vmatmul.mubr.f32.vlgmr.msra.gmra.mxu1 %v123_v12  ;;  %1230 = vmatprep.subr.mxu0 %v523_v25  ;;  %v525_v5 = vld [vmem:[#allocation6 + $0x288] sm:$0xff]  ;;  %v508_v7 = vld [vmem:[#allocation6 + $0x200] sm:$0xff]  ;;  %v1153_v13 = vld [vmem:[%s1713_s2] ss:$0 sm:$0xff] }
  0x4c   :  { %258 = vmatmul.mubr.f32.gmra.mxu0 %v93_v14  ;;  %1393 = vmatprep.mubr.f32.mxu1 %v126_v17  ;;  %v493_v6 = vld [vmem:[#allocation6 + $0x188] sm:$0xff]  ;;  %v524_v9 = vld [vmem:[#allocation6 + $0x280] sm:$0xff] }
  0x4d   :  { %262 = vmatprep.mubr.f32.mxu0 %v1641_v18  ;;  %1396 = vmatprep.subr.mxu1 %v539_v26  ;;  %v492_v10 = vld [vmem:[#allocation6 + $0x180] sm:$0xff] }
  0x4e   :  { %1231 = vmatpush3.msra.mxu0 %v507_v27  ;;  %1397 = vmatpush3.msra.mxu1 %v539_v26 }
  0x4f   :  { %1394 = vmatmul.mubr.f32.gmra.mxu1 %v128_v20  ;;  %1232 = vmatprep.subr.mxu0 %v522_v28 }
  0x50   :  { %263 = vmatmul.mubr.f32.gmra.mxu0 %v96_v21  ;;  %1398 = vmatprep.subr.mxu1 %v538_v29 }
  0x51   :  { %267 = vmatprep.mubr.f32.mxu0 %v1647_v23  ;;  %1233 = vmatpush3.msra.mxu0 %v506_v30 }
  0x52   :  { %1399 = vmatpush3.msra.mxu1 %v538_v29  ;;  %1234 = vmatprep.subr.mxu0 %v521_v31 }
  0x53   :  { %1400 = vmatprep.subr.mxu1 %v537_v32  ;;  %1235 = vmatpush3.msra.mxu0 %v505_v33 }
  0x54   :  { %268 = vmatmul.mubr.f32.gmra.mxu0 %v98_v24  ;;  %1401 = vmatpush3.msra.mxu1 %v537_v32 }
  0x55   :  { %1236 = vmatprep.subr.mxu0 %v520_v34  ;;  %1402 = vmatprep.subr.mxu1 %v536_v35 }
  0x56   :  { %1237 = vmatpush3.msra.mxu0 %v504_v36  ;;  %1403 = vmatpush3.msra.mxu1 %v536_v35 }
  0x57   :  { %1238 = vmatprep.subr.mxu0 %v519_v37  ;;  %1404 = vmatprep.subr.mxu1 %v535_v38 }
  0x58   :  { %1239 = vmatpush3.msra.mxu0 %v503_v39  ;;  %1405 = vmatpush3.msra.mxu1 %v535_v38 }
  0x59   :  { %1240 = vmatprep.subr.mxu0 %v518_v40  ;;  %1406 = vmatprep.subr.mxu1 %v534_v41 }
  0x5a   :  { %1241 = vmatpush3.msra.mxu0 %v502_v42  ;;  %1407 = vmatpush3.msra.mxu1 %v534_v41 }
  0x5b   :  { %1242 = vmatprep.subr.mxu0 %v517_v43  ;;  %1408 = vmatprep.subr.mxu1 %v533_v44 }
  0x5c   :  { %1243 = vmatpush3.msra.mxu0 %v501_v45  ;;  %1409 = vmatpush3.msra.mxu1 %v533_v44 }
  0x5d   :  { %1244 = vmatprep.subr.mxu0 %v516_v46  ;;  %1410 = vmatprep.subr.mxu1 %v532_v47 }
  0x5e   :  { %1245 = vmatpush3.msra.mxu0 %v500_v48  ;;  %1411 = vmatpush3.msra.mxu1 %v532_v47 }
  0x5f   :  { %1246 = vmatprep.subr.mxu0 %v515_v49  ;;  %1412 = vmatprep.subr.mxu1 %v531_v50 }
  0x60   :  { %1247 = vmatpush3.msra.mxu0 %v499_v51  ;;  %1413 = vmatpush3.msra.mxu1 %v531_v50 }
  0x61   :  { %1248 = vmatprep.subr.mxu0 %v514_v52  ;;  %1414 = vmatprep.subr.mxu1 %v530_v54 }
  0x62   :  { %1249 = vmatpush3.msra.mxu0 %v498_v55  ;;  %1415 = vmatpush3.msra.mxu1 %v530_v54 }
  0x63   :  { %1250 = vmatprep.subr.mxu0 %v513_v56  ;;  %1416 = vmatprep.subr.mxu1 %v529_v57 }
  0x64   :  { %1251 = vmatpush3.msra.mxu0 %v497_v58  ;;  %1417 = vmatpush3.msra.mxu1 %v529_v57 }
  0x65   :  { %1252 = vmatprep.subr.mxu0 %v512_v59  ;;  %1418 = vmatprep.subr.mxu1 %v528_v60 }
  0x66   :  { %1253 = vmatpush3.msra.mxu0 %v496_v61  ;;  %1419 = vmatpush3.msra.mxu1 %v528_v60 }
  0x67   :  { %1254 = vmatprep.subr.mxu0 %v511_v62  ;;  %1420 = vmatprep.subr.mxu1 %v527_v63 }
  0x68   :  { %1255 = vmatpush3.msra.mxu0 %v495_v0  ;;  %1421 = vmatpush3.msra.mxu1 %v527_v63 }
  0x69   :  { %1256 = vmatprep.subr.mxu0 %v510_v1  ;;  %1422 = vmatprep.subr.mxu1 %v526_v2 }
  0x6a   :  { %1257 = vmatpush3.msra.mxu0 %v494_v3  ;;  %1423 = vmatpush3.msra.mxu1 %v526_v2 }
  0x6b   :  { %1258 = vmatprep.subr.mxu0 %v509_v4  ;;  %1424 = vmatprep.subr.mxu1 %v525_v5 }
  0x6c   :  { %1259 = vmatpush3.msra.mxu0 %v493_v6  ;;  %1425 = vmatpush3.msra.mxu1 %v525_v5 }
  0x6d   :  { %1260 = vmatprep.subr.mxu0 %v508_v7  ;;  %1426 = vmatprep.subr.mxu1 %v524_v9 }
  0x6e   :  { %1261 = vmatpush3.msra.mxu0 %v492_v10  ;;  %1427 = vmatpush3.msra.mxu1 %v524_v9 }
 0x108   :  { %v1198_v11 = vpop.f32.mrf.mxu0 }
 0x10a   :  { %v1199_v12 = vpop.f32.mrf.mxu0 }
 0x10b   :  { %v1200_v14 = vadd.f32 %v1199_v12, %v1198_v11  ;;  %v1392_v15 = vpop.f32.mrf.mxu1 }
 0x10c   :  { %v1201_v16 = vpop.f32.mrf.mxu0 }
 0x10d   :  { %v255_v17 = vadd.f32 %v1200_v14, %v1153_v13  ;;  %v339_v20 = vpop.f32.mrf.mxu1  ;;  %v1154_v14 = vld [vmem:[#allocation8] ss:$0 sm:$0xff] }
 0x10e   :  { %v1202_v19 = vpop.f32.mrf.mxu0 }
 0x10f   :  { %v1203_v21 = vadd.f32 %v1202_v19, %v1201_v16  ;;  %v1395_v24 = vpop.f32.mrf.mxu1  ;;  %v340_v26 = vadd.f32 %v339_v20, %v255_v17  ;;  %v1155_v20 = vld [vmem:[%s1715_s4] ss:$0 sm:$0xff] }
 0x110   :  { %v1204_v22 = vpop.f32.mrf.mxu0 }
 0x111   :  { %v260_v25 = vadd.f32 %v1203_v21, %v1153_v13  ;;  %v349_v31 = vpop.f32.mrf.mxu1  ;;  %v358_v33 = vadd.f32 %v340_v26, %v1628_v53 }
 0x112   :  { %v1205_v27 = vpop.f32.mrf.mxu0 }
 0x113   :  { %v345_v28 = vadd.f32 %v1392_v15, %v260_v25  ;;  %v1206_v29 = vadd.f32 %v1205_v27, %v1204_v22  ;;  %v366_v39 = vmul.f32 0.2, %v358_v33  ;;  %vm362_vm4 = vcmp.ge.f32.partialorder %v358_v33, 0.0 }
 0x114   :  { %v1207_v30 = vpop.f32.mrf.mxu0 }
 0x115   :  { %v359_v32 = vadd.f32 %v345_v28, %v1633_v8  ;;  %v265_v34 = vadd.f32 %v1206_v29, %v1153_v13  ;;  %v370_v45 = vsel %vm362_vm4, %v358_v33, %v366_v39 }
 0x116   :  { %v1208_v35 = vpop.f32.mrf.mxu0 }
 0x117   :  { %v367_v36 = vmul.f32 0.2, %v359_v32  ;;  %v1209_v37 = vadd.f32 %v1208_v35, %v1207_v30  ;;  %v350_v38 = vadd.f32 %v349_v31, %v265_v34  ;;  %vm363_vm3 = vcmp.ge.f32.partialorder %v359_v32, 0.0 }
 0x119   :  { %v270_v40 = vadd.f32 %v1209_v37, %v1153_v13  ;;  %v360_v41 = vadd.f32 %v350_v38, %v1641_v18  ;;  %v371_v42 = vsel %vm363_vm3, %v359_v32, %v367_v36 }
 0x11a   :  { %v374_v53 = vadd.f32 %v371_v42, %v370_v45 }
 0x11b   :  { %v355_v43 = vadd.f32 %v1395_v24, %v270_v40  ;;  %vm364_vm5 = vcmp.ge.f32.partialorder %v360_v41, 0.0  ;;  %v368_v44 = vmul.f32 0.2, %v360_v41 }
 0x11d   :  { %v361_v8 = vadd.f32 %v355_v43, %v1647_v23  ;;  %v372_v46 = vsel %vm364_vm5, %v360_v41, %v368_v44 }
 0x11e   :  { %v375_v48 = vadd.f32 %v374_v53, %v372_v46 }
 0x11f   :  { %vm365_vm6 = vcmp.ge.f32.partialorder %v361_v8, 0.0  ;;  %v369_v47 = vmul.f32 0.2, %v361_v8 }
 0x121   :  { %v373_v49 = vsel %vm365_vm6, %v361_v8, %v369_v47 }
 0x122   :  { %v376_v50 = vadd.f32 %v375_v48, %v373_v49 }
 0x124   :  { %v377_v51 = vrot.slane %v376_v50, 4 }
 0x126   :  { %v378_v52 = vadd.f32 %v377_v51, %v376_v50 }
 0x128   :  { %v379_v54 = vrot.slane %v378_v52, 2 }
 0x12a   :  { %v380_v55 = vadd.f32 %v379_v54, %v378_v52 }
 0x12c   :  { %v381_v18 = vrot.slane %v380_v55, 1 }
 0x12e   :  { %v382_v56 = vadd.f32 %v381_v18, %v380_v55 }
 0x130   :  { %v384_v57 = vmul.f32 0.03125, %v382_v56 }
 0x132   :  { %v385_v58 = vsub.f32 %v370_v45, %v384_v57  ;;  %v386_v59 = vsub.f32 %v371_v42, %v384_v57  ;;  %v387_v60 = vsub.f32 %v372_v46, %v384_v57  ;;  %v388_v61 = vsub.f32 %v373_v49, %v384_v57 }
 0x134   :  { %v389_v62 = vmul.f32 %v385_v58, %v385_v58  ;;  %v390_v23 = vmul.f32 %v386_v59, %v386_v59  ;;  %v391_v63 = vmul.f32 %v387_v60, %v387_v60  ;;  %v392_v1 = vmul.f32 %v388_v61, %v388_v61 }
 0x136   :  { %v393_v0 = vadd.f32 %v390_v23, %v389_v62 }
 0x138   :  { %v394_v2 = vadd.f32 %v393_v0, %v391_v63  ;;  %v870_v63 = vld [vmem:[#allocation6 + $0x478] sm:$0xff]  ;;  %v869_v0 = vld [vmem:[#allocation6 + $0x470] sm:$0xff] }
 0x139   :  { %1434 = vmatprep.subr.mxu1 %v870_v63 }
 0x13a   :  { %v395_v3 = vadd.f32 %v394_v2, %v392_v1  ;;  %v854_v1 = vld [vmem:[#allocation6 + $0x3f8] sm:$0xff] }
 0x13b   :  { %1294 = vmatprep.subr.mxu0 %v854_v1  ;;  %v838_v2 = vld [vmem:[#allocation6 + $0x378] sm:$0xff] }
 0x13c   :  { %v396_v4 = vrot.slane %v395_v3, 4 }
 0x13e   :  { %v397_v5 = vadd.f32 %v396_v4, %v395_v3  ;;  %v868_v3 = vld [vmem:[#allocation6 + $0x468] sm:$0xff]  ;;  %v853_v4 = vld [vmem:[#allocation6 + $0x3f0] sm:$0xff] }
 0x140   :  { %v398_v6 = vrot.slane %v397_v5, 2 }
 0x142   :  { %v399_v7 = vadd.f32 %v398_v6, %v397_v5  ;;  %v837_v5 = vld [vmem:[#allocation6 + $0x370] sm:$0xff]  ;;  %v867_v6 = vld [vmem:[#allocation6 + $0x460] sm:$0xff] }
 0x144   :  { %v400_v9 = vrot.slane %v399_v7, 1 }
 0x146   :  { %v401_v10 = vadd.f32 %v400_v9, %v399_v7  ;;  %v852_v7 = vld [vmem:[#allocation6 + $0x3e8] sm:$0xff] }
 0x147   :  { %v836_v9 = vld [vmem:[#allocation6 + $0x368] sm:$0xff] }
 0x148   :  { %v402_v11 = vmul.f32 0.03125, %v401_v10  ;;  %v866_v10 = vld [vmem:[#allocation6 + $0x458] sm:$0xff] }
 0x14a   :  { %v403_v12 = vadd.f32 1e-05, %v402_v11  ;;  %v851_v11 = vld [vmem:[#allocation6 + $0x3e0] sm:$0xff] }
 0x14c   :  { %1481 = vrsqrt.f32 %v403_v12  ;;  %v835_v12 = vld [vmem:[#allocation6 + $0x360] sm:$0xff] }
 0x159   :  { %v1482_v13 = vpop.eup %1481 }
 0x15a   :  { %v405_v15 = vmul.f32 %v1482_v13, %v385_v58  ;;  %v406_v16 = vmul.f32 %v1482_v13, %v386_v59  ;;  %v407_v17 = vmul.f32 %v1482_v13, %v387_v60  ;;  %v408_v19 = vmul.f32 %v1482_v13, %v388_v61  ;;  %v865_v13 = vld [vmem:[#allocation6 + $0x450] sm:$0xff] }
 0x15c   :  { %v416_v21 = vmul.f32 %v1154_v14, %v405_v15  ;;  %v417_v22 = vmul.f32 %v1154_v14, %v406_v16  ;;  %v418_v24 = vmul.f32 %v1154_v14, %v407_v17  ;;  %v419_v25 = vmul.f32 %v1154_v14, %v408_v19  ;;  %v850_v14 = vld [vmem:[#allocation6 + $0x3d8] sm:$0xff]  ;;  %v864_v16 = vld [vmem:[#allocation6 + $0x448] sm:$0xff]  ;;  %v849_v17 = vld [vmem:[#allocation6 + $0x3d0] sm:$0xff] }
 0x15d   :  { %v834_v15 = vld [vmem:[#allocation6 + $0x358] sm:$0xff]  ;;  %v833_v19 = vld [vmem:[#allocation6 + $0x350] sm:$0xff] }
 0x15e   :  { %v427_v26 = vadd.f32 %v1155_v20, %v416_v21  ;;  %v428_v27 = vadd.f32 %v1155_v20, %v417_v22  ;;  %v429_v28 = vadd.f32 %v1155_v20, %v418_v24  ;;  %v430_v29 = vadd.f32 %v1155_v20, %v419_v25  ;;  %v863_v20 = vld [vmem:[#allocation6 + $0x440] sm:$0xff]  ;;  %v848_v21 = vld [vmem:[#allocation6 + $0x3c8] sm:$0xff]  ;;  %v862_v24 = vld [vmem:[#allocation6 + $0x438] sm:$0xff] }
 0x15f   :  { %v832_v22 = vld [vmem:[#allocation6 + $0x348] sm:$0xff]  ;;  %v847_v25 = vld [vmem:[#allocation6 + $0x3c0] sm:$0xff] }
 0x160   :  { %431 = vst [vmem:[#allocation2 + $0x4] sm:$0xff] %v427_v26  ;;  %432 = vst [vmem:[#allocation2 + $0xc] sm:$0xff] %v428_v27  ;;  %v831_v26 = vld [vmem:[#allocation6 + $0x340] sm:$0xff]  ;;  %v861_v27 = vld [vmem:[#allocation6 + $0x430] sm:$0xff] }
 0x161   :  { %433 = vst [vmem:[#allocation2 + $0x1c] sm:$0xff] %v429_v28  ;;  %434 = vst [vmem:[#allocation2 + $0x24] sm:$0xff] %v430_v29  ;;  %v846_v28 = vld [vmem:[#allocation6 + $0x3b8] sm:$0xff] }
 0x162   :  { %v830_v29 = vld [vmem:[#allocation6 + $0x338] sm:$0xff] }
 0x167   :  { %v435_v30 = vld [vmem:[#allocation2] sm:$0xff]  ;;  %v436_v31 = vld [vmem:[#allocation2 + $0x8] sm:$0xff]  ;;  %v437_v32 = vld [vmem:[#allocation2 + $0x10] sm:$0xff] }
 0x168   :  { %v462_v33 = vrot.slane %v435_v30, 4  ;;  %v463_v34 = vrot.slane %v436_v31, 4  ;;  %v477_v35 = vrot.slane %v435_v30, 6  ;;  %v478_v36 = vrot.slane %v436_v31, 6  ;;  %v438_v37 = vld [vmem:[#allocation2 + $0x18] sm:$0xff]  ;;  %v439_v38 = vld [vmem:[#allocation2 + $0x20] sm:$0xff] }
 0x169   :  { %v448_v39 = vrot.slane %v435_v30, 2  ;;  %v449_v40 = vrot.slane %v436_v31, 2  ;;  %v480_v41 = vrot.slane %v437_v32, 6  ;;  %v465_v42 = vrot.slane %v437_v32, 4  ;;  %v440_v43 = vld [vmem:[#allocation2 + $0x28] sm:$0xff]  ;;  %v860_v30 = vld [vmem:[#allocation6 + $0x428] sm:$0xff] }
 0x16a   :  { %v1662_v44 = vsel %vm103_vm0, %v462_v33, %v463_v34  ;;  %v479_v45 = vsel %vm476_vm7, %v477_v35, %v478_v36  ;;  %v482_v8 = vrot.slane %v438_v37, 6  ;;  %v483_v46 = vrot.slane %v439_v38, 6  ;;  %v845_v31 = vld [vmem:[#allocation6 + $0x3b0] sm:$0xff]  ;;  %v859_v33 = vld [vmem:[#allocation6 + $0x420] sm:$0xff]  ;;  %v828_v35 = vld [vmem:[#allocation6 + $0x328] sm:$0xff] }
 0x16b   :  { %612 = vmatprep.mubr.f32.mxu0 %v1662_v44  ;;  %1428 = vmatprep.mubr.f32.mxu1 %v479_v45  ;;  %v450_v53 = vsel %vm447_vm8, %v448_v39, %v449_v40  ;;  %v481_v47 = vsel %vm476_vm7, %v478_v36, %v480_v41  ;;  %v1669_v48 = vsel %vm103_vm0, %v463_v34, %v465_v42  ;;  %v451_v49 = vrot.slane %v437_v32, 2  ;;  %v829_v32 = vld [vmem:[#allocation6 + $0x330] sm:$0xff]  ;;  %v844_v34 = vld [vmem:[#allocation6 + $0x3a8] sm:$0xff]  ;;  %v858_v36 = vld [vmem:[#allocation6 + $0x418] sm:$0xff] }
 0x16c   :  { %613 = vmatmul.mubr.f32.vlgmr.msra.gmra.mxu0 %v450_v53  ;;  %1429 = vmatmul.mubr.f32.vlgmr.msra.gmra.mxu1 %v481_v47  ;;  %v484_v50 = vsel %vm476_vm7, %v482_v8, %v483_v46  ;;  %v485_v51 = vrot.slane %v440_v43, 6  ;;  %v467_v52 = vrot.slane %v438_v37, 4  ;;  %v468_v54 = vrot.slane %v439_v38, 4  ;;  %v857_v39 = vld [vmem:[#allocation6 + $0x410] sm:$0xff]  ;;  %v826_v41 = vld [vmem:[#allocation6 + $0x318] sm:$0xff]  ;;  %v856_v42 = vld [vmem:[#allocation6 + $0x408] sm:$0xff] }
 0x16d   :  { %617 = vmatprep.mubr.f32.mxu0 %v1669_v48  ;;  %1431 = vmatprep.mubr.f32.mxu1 %v484_v50  ;;  %v452_v55 = vsel %vm447_vm8, %v449_v40, %v451_v49  ;;  %v453_v56 = vrot.slane %v438_v37, 2  ;;  %v454_v57 = vrot.slane %v439_v38, 2  ;;  %v470_v59 = vrot.slane %v440_v43, 4  ;;  %v843_v37 = vld [vmem:[#allocation6 + $0x3a0] sm:$0xff]  ;;  %v842_v40 = vld [vmem:[#allocation6 + $0x398] sm:$0xff]  ;;  %v825_v45 = vld [vmem:[#allocation6 + $0x310] sm:$0xff] }
 0x16e   :  { %v486_v18 = vsel %vm476_vm7, %v483_v46, %v485_v51  ;;  %v1676_v58 = vsel %vm103_vm0, %v467_v52, %v468_v54  ;;  %v456_v61 = vrot.slane %v440_v43, 2  ;;  %1435 = vmatpush3.msra.mxu1 %v870_v63  ;;  %1295 = vmatpush3.msra.mxu0 %v838_v2  ;;  %v827_v38 = vld [vmem:[#allocation6 + $0x320] sm:$0xff]  ;;  %v841_v43 = vld [vmem:[#allocation6 + $0x390] sm:$0xff]  ;;  %v840_v46 = vld [vmem:[#allocation6 + $0x388] sm:$0xff] }
 0x16f   :  { %v455_v60 = vsel %vm447_vm8, %v453_v56, %v454_v57  ;;  %v1681_v62 = vsel %vm103_vm0, %v468_v54, %v470_v59  ;;  %1436 = vmatprep.subr.mxu1 %v869_v0  ;;  %1296 = vmatprep.subr.mxu0 %v853_v4  ;;  %v855_v8 = vld [vmem:[#allocation6 + $0x400] sm:$0xff]  ;;  %v824_v53 = vld [vmem:[#allocation6 + $0x308] sm:$0xff]  ;;  %v1157_v54 = vld [vmem:[%s1713_s2 + $0x1] ss:$0 sm:$0xff] }
 0x170   :  { %618 = vmatmul.mubr.f32.gmra.mxu0 %v452_v55  ;;  %1432 = vmatmul.mubr.f32.gmra.mxu1 %v486_v18  ;;  %v457_v23 = vsel %vm447_vm8, %v454_v57, %v456_v61  ;;  %v839_v47 = vld [vmem:[#allocation6 + $0x380] sm:$0xff] }
 0x171   :  { %622 = vmatprep.mubr.f32.mxu0 %v1676_v58  ;;  %1437 = vmatpush3.msra.mxu1 %v869_v0  ;;  %v823_v49 = vld [vmem:[#allocation6 + $0x300] sm:$0xff] }
 0x172   :  { %1438 = vmatprep.subr.mxu1 %v868_v3  ;;  %1297 = vmatpush3.msra.mxu0 %v837_v5 }
 0x173   :  { %1439 = vmatpush3.msra.mxu1 %v868_v3  ;;  %1298 = vmatprep.subr.mxu0 %v852_v7 }
 0x174   :  { %623 = vmatmul.mubr.f32.gmra.mxu0 %v455_v60  ;;  %1440 = vmatprep.subr.mxu1 %v867_v6 }
 0x175   :  { %627 = vmatprep.mubr.f32.mxu0 %v1681_v62  ;;  %1441 = vmatpush3.msra.mxu1 %v867_v6 }
 0x176   :  { %1299 = vmatpush3.msra.mxu0 %v836_v9  ;;  %1442 = vmatprep.subr.mxu1 %v866_v10 }
 0x177   :  { %1300 = vmatprep.subr.mxu0 %v851_v11  ;;  %1443 = vmatpush3.msra.mxu1 %v866_v10 }
 0x178   :  { %628 = vmatmul.mubr.f32.gmra.mxu0 %v457_v23  ;;  %1444 = vmatprep.subr.mxu1 %v865_v13 }
 0x179   :  { %1301 = vmatpush3.msra.mxu0 %v835_v12  ;;  %1445 = vmatpush3.msra.mxu1 %v865_v13 }
 0x17a   :  { %1302 = vmatprep.subr.mxu0 %v850_v14  ;;  %1446 = vmatprep.subr.mxu1 %v864_v16 }
 0x17b   :  { %1303 = vmatpush3.msra.mxu0 %v834_v15  ;;  %1447 = vmatpush3.msra.mxu1 %v864_v16 }
 0x17c   :  { %1304 = vmatprep.subr.mxu0 %v849_v17  ;;  %1448 = vmatprep.subr.mxu1 %v863_v20 }
 0x17d   :  { %1305 = vmatpush3.msra.mxu0 %v833_v19  ;;  %1449 = vmatpush3.msra.mxu1 %v863_v20 }
 0x17e   :  { %1306 = vmatprep.subr.mxu0 %v848_v21  ;;  %1450 = vmatprep.subr.mxu1 %v862_v24 }
 0x17f   :  { %1307 = vmatpush3.msra.mxu0 %v832_v22  ;;  %1451 = vmatpush3.msra.mxu1 %v862_v24 }
 0x180   :  { %1308 = vmatprep.subr.mxu0 %v847_v25  ;;  %1452 = vmatprep.subr.mxu1 %v861_v27 }
 0x181   :  { %1309 = vmatpush3.msra.mxu0 %v831_v26  ;;  %1453 = vmatpush3.msra.mxu1 %v861_v27 }
 0x182   :  { %1310 = vmatprep.subr.mxu0 %v846_v28  ;;  %1454 = vmatprep.subr.mxu1 %v860_v30 }
 0x183   :  { %1311 = vmatpush3.msra.mxu0 %v830_v29  ;;  %1455 = vmatpush3.msra.mxu1 %v860_v30 }
 0x184   :  { %1312 = vmatprep.subr.mxu0 %v845_v31  ;;  %1456 = vmatprep.subr.mxu1 %v859_v33 }
 0x185   :  { %1313 = vmatpush3.msra.mxu0 %v829_v32  ;;  %1457 = vmatpush3.msra.mxu1 %v859_v33 }
 0x186   :  { %1314 = vmatprep.subr.mxu0 %v844_v34  ;;  %1458 = vmatprep.subr.mxu1 %v858_v36 }
 0x187   :  { %1315 = vmatpush3.msra.mxu0 %v828_v35  ;;  %1459 = vmatpush3.msra.mxu1 %v858_v36 }
 0x188   :  { %1316 = vmatprep.subr.mxu0 %v843_v37  ;;  %1460 = vmatprep.subr.mxu1 %v857_v39 }
 0x189   :  { %1317 = vmatpush3.msra.mxu0 %v827_v38  ;;  %1461 = vmatpush3.msra.mxu1 %v857_v39 }
 0x18a   :  { %1318 = vmatprep.subr.mxu0 %v842_v40  ;;  %1462 = vmatprep.subr.mxu1 %v856_v42 }
 0x18b   :  { %1319 = vmatpush3.msra.mxu0 %v826_v41  ;;  %1463 = vmatpush3.msra.mxu1 %v856_v42 }
 0x18c   :  { %1320 = vmatprep.subr.mxu0 %v841_v43  ;;  %1464 = vmatprep.subr.mxu1 %v855_v8 }
 0x18d   :  { %1321 = vmatpush3.msra.mxu0 %v825_v45  ;;  %1465 = vmatpush3.msra.mxu1 %v855_v8 }
 0x18e   :  { %1322 = vmatprep.subr.mxu0 %v840_v46 }
 0x18f   :  { %1323 = vmatpush3.msra.mxu0 %v824_v53 }
 0x190   :  { %1324 = vmatprep.subr.mxu0 %v839_v47 }
 0x191   :  { %1325 = vmatpush3.msra.mxu0 %v823_v49 }
 0x22c   :  { %v1262_v50 = vpop.f32.mrf.mxu0  ;;  %v1430_v51 = vpop.f32.mrf.mxu1 }
 0x22e   :  { %v1263_v52 = vpop.f32.mrf.mxu0  ;;  %v699_v57 = vpop.f32.mrf.mxu1 }
 0x22f   :  { %v1264_v55 = vadd.f32 %v1263_v52, %v1262_v50 }
 0x230   :  { %v1265_v18 = vpop.f32.mrf.mxu0  ;;  %v1433_v0 = vpop.f32.mrf.mxu1 }
 0x231   :  { %v615_v56 = vadd.f32 %v1264_v55, %v1157_v54 }
 0x232   :  { %v1266_v59 = vpop.f32.mrf.mxu0  ;;  %v709_v9 = vpop.f32.mrf.mxu1 }
 0x233   :  { %v1267_v60 = vadd.f32 %v1266_v59, %v1265_v18  ;;  %v700_v23 = vadd.f32 %v699_v57, %v615_v56  ;;  %v1160_v59 = vld [vmem:[%s1715_s4 + $0x1] ss:$0 sm:$0xff] }
 0x234   :  { %v1268_v61 = vpop.f32.mrf.mxu0 }
 0x235   :  { %v620_v63 = vadd.f32 %v1267_v60, %v1157_v54  ;;  %v718_v5 = vadd.f32 %v700_v23, %v1662_v44 }
 0x236   :  { %v1269_v1 = vpop.f32.mrf.mxu0 }
 0x237   :  { %v705_v2 = vadd.f32 %v1430_v51, %v620_v63  ;;  %v1270_v3 = vadd.f32 %v1269_v1, %v1268_v61  ;;  %v726_v14 = vmul.f32 0.2, %v718_v5  ;;  %vm722_vm10 = vcmp.ge.f32.partialorder %v718_v5, 0.0 }
 0x238   :  { %v1271_v4 = vpop.f32.mrf.mxu0 }
 0x239   :  { %v719_v6 = vadd.f32 %v705_v2, %v1669_v48  ;;  %v625_v7 = vadd.f32 %v1270_v3, %v1157_v54  ;;  %v730_v21 = vsel %vm722_vm10, %v718_v5, %v726_v14 }
 0x23a   :  { %v1272_v10 = vpop.f32.mrf.mxu0 }
 0x23b   :  { %v727_v11 = vmul.f32 0.2, %v719_v6  ;;  %v710_v12 = vadd.f32 %v709_v9, %v625_v7  ;;  %v1273_v13 = vadd.f32 %v1272_v10, %v1271_v4  ;;  %vm723_vm9 = vcmp.ge.f32.partialorder %v719_v6, 0.0 }
 0x23d   :  { %v720_v15 = vadd.f32 %v710_v12, %v1676_v58  ;;  %v630_v16 = vadd.f32 %v1273_v13, %v1157_v54  ;;  %v731_v17 = vsel %vm723_vm9, %v719_v6, %v727_v11  ;;  %v1158_v54 = vld [vmem:[#allocation8 + $0x1] ss:$0 sm:$0xff] }
 0x23e   :  { %v734_v22 = vadd.f32 %v731_v17, %v730_v21 }
 0x23f   :  { %vm724_vm11 = vcmp.ge.f32.partialorder %v720_v15, 0.0  ;;  %v728_v19 = vmul.f32 0.2, %v720_v15  ;;  %v715_v20 = vadd.f32 %v1433_v0, %v630_v16 }
 0x241   :  { %v732_v44 = vsel %vm724_vm11, %v720_v15, %v728_v19  ;;  %v721_v48 = vadd.f32 %v715_v20, %v1681_v62 }
 0x242   :  { %v735_v25 = vadd.f32 %v734_v22, %v732_v44  ;;  %v1162_v22 = vld [vmem:[%s1713_s2 + $0x2] ss:$0 sm:$0xff] }
 0x243   :  { %vm725_vm12 = vcmp.ge.f32.partialorder %v721_v48, 0.0  ;;  %v729_v24 = vmul.f32 0.2, %v721_v48 }
 0x245   :  { %v733_v26 = vsel %vm725_vm12, %v721_v48, %v729_v24 }
 0x246   :  { %v736_v27 = vadd.f32 %v735_v25, %v733_v26 }
 0x248   :  { %v737_v28 = vrot.slane %v736_v27, 4 }
 0x24a   :  { %v738_v29 = vadd.f32 %v737_v28, %v736_v27 }
 0x24c   :  { %v739_v30 = vrot.slane %v738_v29, 2 }
 0x24e   :  { %v740_v58 = vadd.f32 %v739_v30, %v738_v29 }
 0x250   :  { %v741_v31 = vrot.slane %v740_v58, 1 }
 0x252   :  { %v742_v32 = vadd.f32 %v741_v31, %v740_v58 }
 0x254   :  { %v743_v33 = vmul.f32 0.03125, %v742_v32 }
 0x256   :  { %v744_v34 = vsub.f32 %v730_v21, %v743_v33  ;;  %v745_v35 = vsub.f32 %v731_v17, %v743_v33  ;;  %v746_v36 = vsub.f32 %v732_v44, %v743_v33  ;;  %v747_v37 = vsub.f32 %v733_v26, %v743_v33 }
 0x258   :  { %v748_v38 = vmul.f32 %v744_v34, %v744_v34  ;;  %v749_v39 = vmul.f32 %v745_v35, %v745_v35  ;;  %v750_v62 = vmul.f32 %v746_v36, %v746_v36  ;;  %v751_v41 = vmul.f32 %v747_v37, %v747_v37 }
 0x25a   :  { %v752_v40 = vadd.f32 %v749_v39, %v748_v38 }
 0x25c   :  { %v753_v42 = vadd.f32 %v752_v40, %v750_v62 }
 0x25e   :  { %v754_v43 = vadd.f32 %v753_v42, %v751_v41 }
 0x260   :  { %v755_v45 = vrot.slane %v754_v43, 4 }
 0x262   :  { %v756_v8 = vadd.f32 %v755_v45, %v754_v43 }
 0x264   :  { %v757_v46 = vrot.slane %v756_v8, 2 }
 0x266   :  { %v758_v53 = vadd.f32 %v757_v46, %v756_v8 }
 0x268   :  { %v759_v47 = vrot.slane %v758_v53, 1 }
 0x26a   :  { %v760_v49 = vadd.f32 %v759_v47, %v758_v53 }
 0x26c   :  { %v761_v50 = vmul.f32 0.03125, %v760_v49 }
 0x26e   :  { %v762_v51 = vadd.f32 1e-05, %v761_v50 }
 0x270   :  { %1483 = vrsqrt.f32 %v762_v51 }
 0x27d   :  { %v1484_v52 = vpop.eup %1483 }
 0x27e   :  { %v764_v55 = vmul.f32 %v1484_v52, %v744_v34  ;;  %v765_v18 = vmul.f32 %v1484_v52, %v745_v35  ;;  %v766_v56 = vmul.f32 %v1484_v52, %v746_v36  ;;  %v767_v57 = vmul.f32 %v1484_v52, %v747_v37 }
 0x280   :  { %v776_v60 = vmul.f32 %v1158_v54, %v764_v55  ;;  %v777_v61 = vmul.f32 %v1158_v54, %v765_v18  ;;  %v778_v23 = vmul.f32 %v1158_v54, %v766_v56  ;;  %v779_v63 = vmul.f32 %v1158_v54, %v767_v57 }
 0x282   :  { %v788_v0 = vadd.f32 %v1160_v59, %v776_v60  ;;  %v789_v1 = vadd.f32 %v1160_v59, %v777_v61  ;;  %v790_v2 = vadd.f32 %v1160_v59, %v778_v23  ;;  %v791_v3 = vadd.f32 %v1160_v59, %v779_v63 }
 0x284   :  { %792 = vst [vmem:[#allocation2 + $0x4] sm:$0xff] %v788_v0  ;;  %793 = vst [vmem:[#allocation2 + $0xc] sm:$0xff] %v789_v1 }
 0x285   :  { %794 = vst [vmem:[#allocation2 + $0x1c] sm:$0xff] %v790_v2  ;;  %795 = vst [vmem:[#allocation2 + $0x24] sm:$0xff] %v791_v3 }
 0x28b   :  { %v797_v4 = vld [vmem:[#allocation2 + $0x8] sm:$0xff]  ;;  %v798_v5 = vld [vmem:[#allocation2 + $0x10] sm:$0xff]  ;;  %v796_v6 = vld [vmem:[#allocation2] sm:$0xff] }
 0x28c   :  { %1466 = vmatprep.mubr.f32.mxu1 %v797_v4  ;;  %v809_v7 = vrot.slane %v797_v4, 4  ;;  %v800_v9 = vld [vmem:[#allocation2 + $0x20] sm:$0xff]  ;;  %v808_v10 = vrot.slane %v796_v6, 4  ;;  %v811_v11 = vrot.slane %v798_v5, 4  ;;  %v799_v12 = vld [vmem:[#allocation2 + $0x18] sm:$0xff]  ;;  %v801_v14 = vld [vmem:[#allocation2 + $0x28] sm:$0xff] }
 0x28d   :  { %1467 = vmatmul.mubr.f32.vlgmr.msra.gmra.mxu1 %v798_v5  ;;  %v813_v16 = vrot.slane %v799_v12, 4  ;;  %v814_v17 = vrot.slane %v800_v9, 4  ;;  %v816_v19 = vrot.slane %v801_v14, 4 }
 0x28e   :  { %1469 = vmatprep.mubr.f32.mxu1 %v800_v9  ;;  %v810_v13 = vsel %vm103_vm0, %v808_v10, %v809_v7  ;;  %v812_v15 = vsel %vm103_vm0, %v809_v7, %v811_v11 }
 0x28f   :  { %943 = vmatprep.mubr.f32.mxu0 %v810_v13  ;;  %v815_v20 = vsel %vm103_vm0, %v813_v16, %v814_v17  ;;  %v817_v21 = vsel %vm103_vm0, %v814_v17, %v816_v19 }
 0x290   :  { %944 = vmatmul.mubr.f32.vlgmr.msra.gmra.mxu0 %v796_v6 }
 0x291   :  { %1470 = vmatmul.mubr.f32.gmra.mxu1 %v801_v14  ;;  %948 = vmatprep.mubr.f32.mxu0 %v812_v15 }
 0x294   :  { %949 = vmatmul.mubr.f32.gmra.mxu0 %v797_v4 }
 0x295   :  { %953 = vmatprep.mubr.f32.mxu0 %v815_v20 }
 0x298   :  { %954 = vmatmul.mubr.f32.gmra.mxu0 %v799_v12 }
 0x299   :  { %958 = vmatprep.mubr.f32.mxu0 %v817_v21 }
 0x29c   :  { %959 = vmatmul.mubr.f32.gmra.mxu0 %v800_v9 }
 0x34d   :  { %v1468_v48 = vpop.f32.mrf.mxu1 }
 0x34f   :  { %v1030_v28 = vpop.f32.mrf.mxu1 }
 0x350   :  { %v1326_v44 = vpop.f32.mrf.mxu0 }
 0x351   :  { %v1471_v33 = vpop.f32.mrf.mxu1 }
 0x352   :  { %v1327_v24 = vpop.f32.mrf.mxu0 }
 0x353   :  { %v1328_v25 = vadd.f32 %v1327_v24, %v1326_v44  ;;  %v1040_v40 = vpop.f32.mrf.mxu1  ;;  %v1163_v24 = vld [vmem:[#allocation8 + $0x2] ss:$0 sm:$0xff] }
 0x354   :  { %v1329_v26 = vpop.f32.mrf.mxu0 }
 0x355   :  { %v946_v27 = vadd.f32 %v1328_v25, %v1162_v22 }
 0x356   :  { %v1330_v29 = vpop.f32.mrf.mxu0 }
 0x357   :  { %v1331_v30 = vadd.f32 %v1330_v29, %v1329_v26  ;;  %v1031_v31 = vadd.f32 %v1030_v28, %v946_v27  ;;  %v1165_v29 = vld [vmem:[%s1715_s4 + $0x2] ss:$0 sm:$0xff]  ;;  %s1547_s4 = scalar_lea.vmem %s1141_s22, 512 }
 0x358   :  { %v1332_v58 = vpop.f32.mrf.mxu0  ;;  %p1548_p1 = scmp.ne.s32.totalorder %s1141_s22, %s1547_s4  ;;  %p1553_p3 = scmp.lt.s32.totalorder %s1547_s4, %s1547_s4 }
 0x359   :  { %v951_v32 = vadd.f32 %v1331_v30, %v1162_v22  ;;  %v1049_v38 = vadd.f32 %v1031_v31, %v810_v13 }
 0x35a   :  { %v1333_v34 = vpop.f32.mrf.mxu0  ;;  %p1554_p4 = por %p1553_p3, %p1552_p2 }
 0x35b   :  { %v1036_v35 = vadd.f32 %v1468_v48, %v951_v32  ;;  %v1334_v36 = vadd.f32 %v1333_v34, %v1332_v58  ;;  %v1057_v8 = vmul.f32 0.2, %v1049_v38  ;;  %vm1053_vm14 = vcmp.ge.f32.partialorder %v1049_v38, 0.0 }
 0x35c   :  { %v1335_v37 = vpop.f32.mrf.mxu0  ;;  %p1555_p5 = pnand %p1554_p4, %p1548_p1 }
 0x35d   :  { %v1050_v39 = vadd.f32 %v1036_v35, %v812_v15  ;;  %v956_v62 = vadd.f32 %v1334_v36, %v1162_v22  ;;  %v1061_v51 = vsel %vm1053_vm14, %v1049_v38, %v1057_v8 }
 0x35e   :  { %v1336_v41 = vpop.f32.mrf.mxu0 }
 0x35f   :  { %v1058_v42 = vmul.f32 0.2, %v1050_v39  ;;  %v1041_v43 = vadd.f32 %v1040_v40, %v956_v62  ;;  %v1337_v45 = vadd.f32 %v1336_v41, %v1335_v37  ;;  %vm1054_vm13 = vcmp.ge.f32.partialorder %v1050_v39, 0.0 }
 0x361   :  { %v1051_v46 = vadd.f32 %v1041_v43, %v815_v20  ;;  %v961_v53 = vadd.f32 %v1337_v45, %v1162_v22  ;;  %v1062_v47 = vsel %vm1054_vm13, %v1050_v39, %v1058_v42 }
 0x362   :  { %v1065_v55 = vadd.f32 %v1062_v47, %v1061_v51 }
 0x363   :  { %vm1055_vm15 = vcmp.ge.f32.partialorder %v1051_v46, 0.0  ;;  %v1059_v49 = vmul.f32 0.2, %v1051_v46  ;;  %v1046_v50 = vadd.f32 %v1471_v33, %v961_v53 }
 0x365   :  { %v1063_v52 = vsel %vm1055_vm15, %v1051_v46, %v1059_v49  ;;  %v1052_v54 = vadd.f32 %v1046_v50, %v817_v21 }
 0x366   :  { %v1066_v56 = vadd.f32 %v1065_v55, %v1063_v52 }
 0x367   :  { %vm1056_vm0 = vcmp.ge.f32.partialorder %v1052_v54, 0.0  ;;  %v1060_v18 = vmul.f32 0.2, %v1052_v54 }
 0x369   :  { %v1064_v57 = vsel %vm1056_vm0, %v1052_v54, %v1060_v18 }
 0x36a   :  { %v1067_v59 = vadd.f32 %v1066_v56, %v1064_v57 }
 0x36c   :  { %v1068_v60 = vrot.slane %v1067_v59, 4 }
 0x36e   :  { %v1069_v61 = vadd.f32 %v1068_v60, %v1067_v59 }
 0x370   :  { %v1070_v23 = vrot.slane %v1069_v61, 2 }
 0x372   :  { %v1071_v63 = vadd.f32 %v1070_v23, %v1069_v61 }
 0x374   :  { %v1072_v0 = vrot.slane %v1071_v63, 1 }
 0x376   :  { %v1073_v1 = vadd.f32 %v1072_v0, %v1071_v63 }
 0x378   :  { %v1074_v2 = vmul.f32 0.03125, %v1073_v1 }
 0x37a   :  { %v1075_v3 = vsub.f32 %v1061_v51, %v1074_v2  ;;  %v1076_v4 = vsub.f32 %v1062_v47, %v1074_v2  ;;  %v1077_v5 = vsub.f32 %v1063_v52, %v1074_v2  ;;  %v1078_v6 = vsub.f32 %v1064_v57, %v1074_v2 }
 0x37c   :  { %v1079_v7 = vmul.f32 %v1075_v3, %v1075_v3  ;;  %v1080_v9 = vmul.f32 %v1076_v4, %v1076_v4  ;;  %v1081_v10 = vmul.f32 %v1077_v5, %v1077_v5  ;;  %v1082_v12 = vmul.f32 %v1078_v6, %v1078_v6 }
 0x37e   :  { %v1083_v11 = vadd.f32 %v1080_v9, %v1079_v7 }
 0x380   :  { %v1084_v13 = vadd.f32 %v1083_v11, %v1081_v10 }
 0x382   :  { %v1085_v14 = vadd.f32 %v1084_v13, %v1082_v12 }
 0x384   :  { %v1086_v15 = vrot.slane %v1085_v14, 4 }
 0x386   :  { %v1087_v16 = vadd.f32 %v1086_v15, %v1085_v14 }
 0x388   :  { %v1088_v17 = vrot.slane %v1087_v16, 2 }
 0x38a   :  { %v1089_v19 = vadd.f32 %v1088_v17, %v1087_v16 }
 0x38c   :  { %v1090_v20 = vrot.slane %v1089_v19, 1 }
 0x38e   :  { %v1091_v21 = vadd.f32 %v1090_v20, %v1089_v19 }
 0x390   :  { %v1092_v44 = vmul.f32 0.03125, %v1091_v21 }
 0x392   :  { %v1093_v48 = vadd.f32 1e-05, %v1092_v44 }
 0x394   :  { %1485 = vrsqrt.f32 %v1093_v48 }
 0x3a1   :  { %v1486_v22 = vpop.eup %1485 }
 0x3a2   :  { %v1095_v25 = vmul.f32 %v1486_v22, %v1075_v3  ;;  %v1096_v26 = vmul.f32 %v1486_v22, %v1076_v4  ;;  %v1097_v27 = vmul.f32 %v1486_v22, %v1077_v5  ;;  %v1098_v28 = vmul.f32 %v1486_v22, %v1078_v6 }
 0x3a4   :  { %v1107_v30 = vmul.f32 %v1163_v24, %v1095_v25  ;;  %v1108_v58 = vmul.f32 %v1163_v24, %v1096_v26  ;;  %v1109_v31 = vmul.f32 %v1163_v24, %v1097_v27  ;;  %v1110_v32 = vmul.f32 %v1163_v24, %v1098_v28 }
 0x3a6   :  { %v1119_v33 = vadd.f32 %v1165_v29, %v1107_v30  ;;  %v1120_v34 = vadd.f32 %v1165_v29, %v1108_v58  ;;  %v1121_v35 = vadd.f32 %v1165_v29, %v1109_v31  ;;  %v1122_v36 = vadd.f32 %v1165_v29, %v1110_v32 }
 0x3a8   :  { %1123 = vst [vmem:[#allocation2 + $0x4] sm:$0xff] %v1119_v33  ;;  %1124 = vst [vmem:[#allocation2 + $0xc] sm:$0xff] %v1120_v34 }
 0x3a9   :  { %1125 = vst [vmem:[#allocation2 + $0x1c] sm:$0xff] %v1121_v35  ;;  %1126 = vst [vmem:[#allocation2 + $0x24] sm:$0xff] %v1122_v36 }
 0x3aa   :  { %1131 = vst [vmem:[#allocation9] sm:$0xff] %v1119_v33  ;;  %1132 = vst [vmem:[#allocation9 + $0x8] sm:$0xff] %v1120_v34 }
 0x3ab   :  { %1133 = vst [vmem:[#allocation9 + $0x10] sm:$0xff] %v1121_v35  ;;  %1134 = vst [vmem:[#allocation9 + $0x18] sm:$0xff] %v1122_v36 }
 0x3ac   :  { %1558 = shalt.err (!%p1555_p5)
}
 0x3ad   :  { %1146 = dma.vmem_to_hbm [thread:$0]  %s1141_s22, 512, %s1716_s5, [#allocation5], %s1575_s23, %s1575_s23, %s1576_s24  }
 0x3ae   :  { %1571 = dma.done.wait [#allocation5], 512  }
 0x3af   :  { %1572 = vsyncadd [#allocation5], 4294966784 }
 0x3b0   :  { %1150 = vsyncpa [#allocation4], 1 }
 0x3b1   :  { %1151 = vsyncpa [#allocation7], 1 }
 0x3b2   :  { %1152 = vsyncpa [#allocation5], 1 }

</bundles_post_ra>
